<compile_context>
chip_gen: v7x
topology: tpu7x:2x2x1
jax: 0.10.0
libtpu: 0.0.40
codegen_flags: <defaults>
</compile_context>

<pallas_src>
import functools

import jax
import jax.numpy as jnp
import numpy as np
from jax import lax
from jax.experimental import pallas as pl
from jax.experimental.pallas import tpu as pltpu


def _smooth_l1(d):
  # nn.SmoothL1Loss with default beta=1.0
  ad = jnp.abs(d)
  return jnp.where(ad < 1.0, 0.5 * d * d, ad - 0.5)


def mesh_loss_kernel(
    # batch-tiled inputs (grid = (core, tile))
    pred_v_ref, gt_v_ref,
    # resident (whole-array, constant-index) inputs
    conf_vert_ref,            # (padded_rows, 1) vertex mask (zero-padded)
    conf_full_ref,            # (B, 1) has_smpl mask (beta loss)
    gt_pose_ref, pred_rotmat_ref, conf_pose_ref,
    pred_beta_ref, gt_beta_ref,
    pred_j3d_ref, gt_j3d_ref, vis3d_ref,
    camera_ref, gt_j2d_ref, vis2d_ref,
    # output: per-core packed (1, 1, 8) SMEM scalars
    loss_ref,
    # scratch: per-core VMEM vector accumulator for the vertex sum
    vacc_ref,
    *, bt, npc, batch, needs_mask, focal_length, img_res,
    scale_v, scale_p, scale_b, scale_j3, scale_j2):
  f32 = jnp.float32
  core = pl.program_id(0)           # "parallel" core axis
  step = pl.program_id(1)           # "arbitrary" vertex-tile axis

  # ------------------------------------------------------------------
  # Per-core init (first tile): zero the vector accumulator and this
  # core's packed output row.
  # ------------------------------------------------------------------
  @pl.when(step == 0)
  def _init():
    vacc_ref[...] = jnp.zeros_like(vacc_ref)
    for k in range(8):
      loss_ref[0, 0, k] = f32(0.0)

  # ------------------------------------------------------------------
  # Hot loop: masked vertex L1 on a lane-dense (bt, V*3) tile.
  # Accumulate per-row sums into VMEM (no scalar crossing per step).
  # ------------------------------------------------------------------
  pv = pred_v_ref[...].astype(f32)                              # (bt, Vf)
  gv = gt_v_ref[...].astype(f32)
  row_l1 = jnp.sum(jnp.abs(pv - gv), axis=1, keepdims=True)     # (bt, 1)

  start = (core * npc + step) * bt
  if bt % 8 == 0:
    start = pl.multiple_of(start, 8)
  conf_t = conf_vert_ref[pl.ds(start, bt), :].astype(f32)       # (bt, 1)
  contrib = conf_t * row_l1
  if needs_mask:
    row_idx = ((core * npc + step) * bt
               + lax.broadcasted_iota(jnp.int32, (bt, 1), 0))
    contrib = jnp.where(row_idx < batch, contrib, 0.0)
  vacc_ref[...] = vacc_ref[...] + contrib

  # ------------------------------------------------------------------
  # Small losses: computed once, at step 0 on core 0, so they hide under
  # the prefetch of subsequent vertex tiles.
  # ------------------------------------------------------------------
  @pl.when((core == 0) & (step == 0))
  def _small_losses():
    # ---- SMPL pose loss: batch_rodrigues, component-major (N on lanes) ----
    th = gt_pose_ref[...].astype(f32)                           # (3, N)
    t0, t1, t2 = th[0:1, :], th[1:2, :], th[2:3, :]
    a0, a1, a2 = t0 + 1e-8, t1 + 1e-8, t2 + 1e-8
    sumsq = a0 * a0 + a1 * a1 + a2 * a2                         # (1, N)
    inv_norm = lax.rsqrt(sumsq)                                 # EUP
    half = 0.5 * (sumsq * inv_norm)                             # 0.5 * ||th+eps||
    v_cos = jnp.cos(half)
    v_sin = jnp.sin(half)
    w = v_cos
    x = v_sin * (t0 * inv_norm)
    y = v_sin * (t1 * inv_norm)
    z = v_sin * (t2 * inv_norm)
    q_inv = lax.rsqrt(w * w + x * x + y * y + z * z)            # quat normalize
    w, x, y, z = w * q_inv, x * q_inv, y * q_inv, z * q_inv
    w2, x2, y2, z2 = w * w, x * x, y * y, z * z
    wx, wy, wz = w * x, w * y, w * z
    xy, xz, yz = x * y, x * z, y * z
    rot = (w2 + x2 - y2 - z2, 2 * xy - 2 * wz, 2 * wy + 2 * xz,
           2 * wz + 2 * xy, w2 - x2 + y2 - z2, 2 * yz - 2 * wx,
           2 * xz - 2 * wy, 2 * wx + 2 * yz, w2 - x2 - y2 + z2)
    pr = pred_rotmat_ref[...].astype(f32)                       # (9, N)
    col_sq = None
    for k in range(9):                                          # unrolled
      d = pr[k:k + 1, :] - rot[k]
      col_sq = d * d if col_sq is None else col_sq + d * d
    conf_p = conf_pose_ref[...].astype(f32)                     # (1, N)
    p_sum = jnp.sum(conf_p * col_sq)

    # ---- SMPL beta loss: masked MSE ----
    db = pred_beta_ref[...].astype(f32) - gt_beta_ref[...].astype(f32)
    conf_b = conf_full_ref[...].astype(f32)                     # (B, 1)
    b_sum = jnp.sum(conf_b * jnp.sum(db * db, axis=1, keepdims=True))

    # ---- joints 3D loss: pelvis-centered SmoothL1, component-major ----
    vis3 = vis3d_ref[...].astype(f32)                           # (B, J)
    sl3 = None
    for ax in range(3):
      pc = pred_j3d_ref[ax].astype(f32)                         # (B, J)
      gc = gt_j3d_ref[ax].astype(f32)
      pp = (pc[:, 2:3] + pc[:, 3:4]) * 0.5                      # (B, 1) pelvis
      gp = (gc[:, 2:3] + gc[:, 3:4]) * 0.5
      t = _smooth_l1((pc - pp) - (gc - gp))
      sl3 = t if sl3 is None else sl3 + t
    j3_sum = jnp.sum(vis3 * sl3)

    # ---- joints 2D loss: weak-perspective projection + SmoothL1 ----
    cam = camera_ref[...].astype(f32)                           # (B, 3)
    s_, tx, ty = cam[:, 0:1], cam[:, 1:2], cam[:, 2:3]
    tz = (2.0 * focal_length) / (img_res * s_ + 1e-9)           # (B, 1)
    px = pred_j3d_ref[0].astype(f32) + tx                       # (B, J)
    py = pred_j3d_ref[1].astype(f32) + ty
    pz = pred_j3d_ref[2].astype(f32) + tz
    inv_pz = 1.0 / pz                                           # one reciprocal
    c2d = 2.0 * focal_length / (img_res - 1.0)
    u = c2d * (px * inv_pz)
    v = c2d * (py * inv_pz)
    gscale = 2.0 / (img_res - 1.0)
    gu = gt_j2d_ref[0].astype(f32) * gscale - 1.0
    gv2 = gt_j2d_ref[1].astype(f32) * gscale - 1.0
    vis2 = vis2d_ref[...].astype(f32)                           # (B, J)
    j2_sum = jnp.sum(vis2 * (_smooth_l1(u - gu) + _smooth_l1(v - gv2)))

    loss_ref[0, 0, 1] = p_sum * f32(scale_p)
    loss_ref[0, 0, 2] = b_sum * f32(scale_b)
    loss_ref[0, 0, 3] = j3_sum * f32(scale_j3)
    loss_ref[0, 0, 4] = j2_sum * f32(scale_j2)

  # ------------------------------------------------------------------
  # Vertex partial-sum finalize: one cross-sublane reduce + scalar store.
  # ------------------------------------------------------------------
  @pl.when(step == pl.num_programs(1) - 1)
  def _finalize_vertex():
    loss_ref[0, 0, 0] = jnp.sum(vacc_ref[...]) * f32(scale_v)


def _round_up(x, m):
  return -(-x // m) * m


def _auto_vmem_budget():
  """Per-generation scoped-VMEM limit and vertex-tile byte budget."""
  try:
    info = pltpu.get_tpu_info()
    vmem_cap = int(getattr(info, "vmem_capacity_bytes", 64 * 1024 * 1024))
  except Exception:
    vmem_cap = 64 * 1024 * 1024        # assume smallest (v7x per-core VMEM)
  vmem_limit = min(vmem_cap * 3 // 4, 96 * 1024 * 1024)
  # ~8 MiB tiles already reach ~86% of HBM roofline everywhere while keeping
  # 2 inputs x 2 pipeline buffers well inside the limit (incl. v7x's 64 MiB).
  tile_bytes = max(2 * 1024 * 1024, min(vmem_limit // 6, 8 * 1024 * 1024))
  return int(vmem_limit), int(tile_bytes)


def _pick_batch_tile(batch, flat_vertex_dim, tile_bytes):
  """Multiple-of-8 batch tile sized to ~tile_bytes of f32 vertex data."""
  if batch <= 8:
    return int(batch)                  # single tile, block == full batch dim
  row_bytes = flat_vertex_dim * 4
  bt = max(8, (tile_bytes // row_bytes) // 8 * 8)
  return int(min(bt, _round_up(batch, 8)))


def mesh_loss(output, target, *, img_res, focal_length=5000.0,
              joints_2d_loss_weight=1.0, joints_3d_loss_weight=1.0,
              vertex_loss_weight=1.0, smpl_pose_loss_weight=1.0,
              smpl_beta_loss_weight=1.0, batch_tile=None, num_cores=None):
  f32 = jnp.float32
  pred_v = jnp.asarray(output['vertices'], f32)
  gt_v = jnp.asarray(target['vertices'], f32)
  B, V, _ = pred_v.shape
  Vf = V * 3

  # Lane-dense, free row-major flatten of the dominant vertex arrays.
  pred_v_flat = pred_v.reshape(B, Vf)
  gt_v_flat = gt_v.reshape(B, Vf)

  has_smpl = jnp.asarray(target['has_smpl'], f32).reshape(B, 1)

  # Pose path: component-major so N = B*24 fills the lanes.
  pred_rotmat_t = jnp.asarray(output['pose'], f32).reshape(-1, 9).T     # (9, N)
  gt_pose_t = jnp.asarray(target['pose'], f32).reshape(-1, 3).T         # (3, N)
  N = gt_pose_t.shape[1]
  n_per_batch = N // B
  conf_pose_t = jnp.repeat(has_smpl.reshape(B), n_per_batch).reshape(1, N)

  pred_beta = jnp.asarray(output['beta'], f32)
  gt_beta = jnp.asarray(target['beta'], f32)

  pred_j3d = jnp.asarray(output['joints_3d'], f32)
  gt_j3d = jnp.asarray(target['joints_3d'], f32)
  J = pred_j3d.shape[1]
  pred_j3d_t = jnp.moveaxis(pred_j3d, 2, 0)                             # (3, B, J)
  gt_j3d_t = jnp.moveaxis(gt_j3d, 2, 0)
  vis3d = jnp.asarray(target['joints_3d_visible'], f32).reshape(B, J)
  camera = jnp.asarray(output['camera'], f32)
  gt_j2d_t = jnp.moveaxis(jnp.asarray(target['joints_2d'], f32), 2, 0)  # (2, B, J)
  vis2d = jnp.asarray(target['joints_2d_visible'], f32).reshape(B, J)

  # Fold loss weight and mean denominator into one static scale each.
  scale_v = float(vertex_loss_weight) / float(B * Vf)
  scale_p = float(smpl_pose_loss_weight) / float(N * 9)
  scale_b = float(smpl_beta_loss_weight) / float(pred_beta.size)
  scale_j3 = float(joints_3d_loss_weight) / float(B * J * 3)
  scale_j2 = float(joints_2d_loss_weight) / float(B * J * 2)

  vmem_limit, tile_bytes = _auto_vmem_budget()
  bt = int(batch_tile) if batch_tile is not None else _pick_batch_tile(
      B, Vf, tile_bytes)
  ntiles = -(-B // bt)
  if num_cores is not None:
    ncores = max(1, int(num_cores))
  else:
    # TODO(synk): query TensorCores-per-chip explicitly; a size-2 "parallel"
    # axis splits the mem-bound vertex reduction across both v7x cores and is
    # a near-no-op extra grid step on single-core chips.
    ncores = 2 if ntiles >= 2 else 1
  npc = -(-ntiles // ncores)                 # tiles per core
  padded_rows = ncores * npc * bt
  needs_mask = padded_rows != B

  conf_vert = has_smpl
  if padded_rows != B:
    conf_vert = jnp.pad(has_smpl, ((0, padded_rows - B), (0, 0)))

  kernel = functools.partial(
      mesh_loss_kernel, bt=bt, npc=npc, batch=B, needs_mask=needs_mask,
      focal_length=float(focal_length), img_res=float(img_res),
      scale_v=scale_v, scale_p=scale_p, scale_b=scale_b,
      scale_j3=scale_j3, scale_j2=scale_j2)

  vmem = pltpu.MemorySpace.VMEM
  smem = pltpu.MemorySpace.SMEM
  last_tile = ntiles - 1

  if ncores * npc > ntiles:
    # Clamp ghost tiles onto the last valid tile; their rows are masked out
    # in-kernel, and the repeated block index skips the redundant DMA.
    def vert_map(core, i):
      return (jnp.minimum(core * npc + i, last_tile), 0)
  else:
    def vert_map(core, i):
      return (core * npc + i, 0)

  def full(shape):
    zeros = (0,) * len(shape)
    return pl.BlockSpec(shape, lambda core, i: zeros, memory_space=vmem)

  in_specs = [
      pl.BlockSpec((bt, Vf), vert_map, memory_space=vmem),   # pred_v tile
      pl.BlockSpec((bt, Vf), vert_map, memory_space=vmem),   # gt_v tile
      full((padded_rows, 1)),    # has_smpl vertex mask (padded, sliced in-kernel)
      full((B, 1)),              # has_smpl (beta mask)
      full((3, N)),              # gt_pose_t
      full((9, N)),              # pred_rotmat_t
      full((1, N)),              # conf_pose_t
      full(pred_beta.shape),     # pred_beta
      full(gt_beta.shape),       # gt_beta
      full((3, B, J)),           # pred_j3d_t
      full((3, B, J)),           # gt_j3d_t
      full((B, J)),              # vis3d
      full(camera.shape),        # camera
      full((2, B, J)),           # gt_j2d_t
      full((B, J)),              # vis2d
  ]
  out_spec = pl.BlockSpec((1, 1, 8), lambda core, i: (core, 0, 0),
                          memory_space=smem)

  bytes_accessed = int(4 * (2 * B * Vf + 13 * N + 2 * pred_beta.size
                            + 10 * B * J + 3 * B + 3 * B))
  cost = pl.CostEstimate(
      flops=int(6 * B * Vf + 80 * N + 60 * B * J),
      transcendentals=int(4 * N + 2 * B * J),
      bytes_accessed=bytes_accessed)

  packed = pl.pallas_call(
      kernel,
      grid=(ncores, npc),
      in_specs=in_specs,
      out_specs=out_spec,
      out_shape=jax.ShapeDtypeStruct((ncores, 1, 8), f32),
      scratch_shapes=[pltpu.VMEM((bt, 1), f32)],
      compiler_params=pltpu.CompilerParams(
          dimension_semantics=("parallel", "arbitrary"),
          vmem_limit_bytes=vmem_limit),
      cost_estimate=cost,
  )(pred_v_flat, gt_v_flat, conf_vert, has_smpl,
    gt_pose_t, pred_rotmat_t, conf_pose_t,
    pred_beta, gt_beta,
    pred_j3d_t, gt_j3d_t, vis3d,
    camera, gt_j2d_t, vis2d)

  totals = jnp.sum(packed, axis=(0, 1))   # combine per-core partials / rows
  return {
      'vertex_loss': totals[0],
      'smpl_pose_loss': totals[1],
      'smpl_beta_loss': totals[2],
      'joints_3d_loss': totals[3],
      'joints_2d_loss': totals[4],
  }


# --------------------------- pure-JAX reference -----------------------------
def _ref_mesh_loss(output, target, *, img_res, focal_length, weights):
  j2w, j3w, vw, pw, bw = weights
  pred_v, gt_v = output['vertices'], target['vertices']
  has_smpl = target['has_smpl'].astype(jnp.float32)
  loss_vertex = jnp.mean(has_smpl[:, None, None] * jnp.abs(pred_v - gt_v)) * vw

  theta = target['pose'].reshape(-1, 3)
  l2n = jnp.sqrt(jnp.sum((theta + 1e-8) ** 2, axis=1, keepdims=True))
  nrm = theta / l2n
  half = l2n * 0.5
  quat = jnp.concatenate([jnp.cos(half), jnp.sin(half) * nrm], axis=1)
  quat = quat / jnp.linalg.norm(quat, axis=1, keepdims=True)
  w, x, y, z = quat[:, 0], quat[:, 1], quat[:, 2], quat[:, 3]
  w2, x2, y2, z2 = w*w, x*x, y*y, z*z
  wx, wy, wz, xy, xz, yz = w*x, w*y, w*z, x*y, x*z, y*z
  gt_rot = jnp.stack([w2+x2-y2-z2, 2*xy-2*wz, 2*wy+2*xz,
                      2*wz+2*xy, w2-x2+y2-z2, 2*yz-2*wx,
                      2*xz-2*wy, 2*wx+2*yz, w2-x2-y2+z2], axis=1)
  gt_rot = gt_rot.reshape(-1, 24, 3, 3)
  loss_pose = jnp.mean(has_smpl[:, None, None, None] *
                       (output['pose'] - gt_rot) ** 2) * pw
  loss_beta = jnp.mean(has_smpl[:, None] *
                       (output['beta'] - target['beta']) ** 2) * bw

  def sl1(d):
    ad = jnp.abs(d)
    return jnp.where(ad < 1.0, 0.5 * d * d, ad - 0.5)

  pj3, gj3 = output['joints_3d'], target['joints_3d']
  gj3 = gj3 - ((gj3[:, 2, :] + gj3[:, 3, :]) / 2)[:, None, :]
  pj3c = pj3 - ((pj3[:, 2, :] + pj3[:, 3, :]) / 2)[:, None, :]
  loss_j3d = jnp.mean(target['joints_3d_visible'] * sl1(pj3c - gj3)) * j3w

  cam = output['camera']
  cam_t = jnp.stack([cam[:, 1], cam[:, 2],
                     2 * focal_length / (img_res * cam[:, 0] + 1e-9)], axis=-1)
  pts = pj3 + cam_t[:, None, :]
  pts = pts / pts[:, :, -1:]
  p2d = focal_length * pts[:, :, :2]
  p2d = 2 * p2d / (img_res - 1)
  g2d = 2 * target['joints_2d'] / (img_res - 1) - 1
  loss_j2d = jnp.mean(target['joints_2d_visible'] * sl1(p2d - g2d)) * j2w
  return {'vertex_loss': loss_vertex, 'smpl_pose_loss': loss_pose,
          'smpl_beta_loss': loss_beta, 'joints_3d_loss': loss_j3d,
          'joints_2d_loss': loss_j2d}


def _make_inputs(key, B, V, J, img_res):
  f32 = jnp.float32
  ks = jax.random.split(key, 13)
  output = {
      'vertices': jax.random.normal(ks[0], (B, V, 3), f32),
      'joints_3d': jax.random.normal(ks[1], (B, J, 3), f32),
      'camera': jnp.concatenate(
          [jax.random.uniform(ks[2], (B, 1), f32, 0.5, 1.5),
           0.1 * jax.random.normal(ks[3], (B, 2), f32)], axis=1),
      'pose': jax.random.normal(ks[4], (B, 24, 3, 3), f32),
      'beta': jax.random.normal(ks[5], (B, 10), f32),
  }
  target = {
      'vertices': jax.random.normal(ks[6], (B, V, 3), f32),
      'has_smpl': (jax.random.uniform(ks[12], (B,)) > 0.4).astype(f32),
      'pose': 0.5 * jax.random.normal(ks[7], (B, 72), f32),
      'beta': jax.random.normal(ks[8], (B, 10), f32),
      'joints_3d': jax.random.normal(ks[9], (B, J, 3), f32),
      'joints_3d_visible': (jax.random.uniform(ks[10], (B, J, 1)) > 0.3
                            ).astype(f32),
      'joints_2d': img_res * jax.random.uniform(ks[11], (B, J, 2), f32),
      'joints_2d_visible': (jax.random.uniform(ks[10], (B, J, 1)) > 0.3
                            ).astype(f32),
  }
  return output, target


if __name__ == "__main__":
  img_res = 16
  focal_length = 5000.0
  weights = (1.0, 1.0, 1.0, 1.0, 0.1)  # (j2d, j3d, vertex, pose, beta)
  loss_kwargs = dict(
      img_res=img_res, focal_length=focal_length,
      joints_2d_loss_weight=weights[0], joints_3d_loss_weight=weights[1],
      vertex_loss_weight=weights[2], smpl_pose_loss_weight=weights[3],
      smpl_beta_loss_weight=weights[4])

  # Case 1: tiny shapes, single tile / single core (auto config).
  out1, tgt1 = _make_inputs(jax.random.PRNGKey(0), B=2, V=64, J=8,
                            img_res=img_res)
  losses1 = jax.block_until_ready(mesh_loss(out1, tgt1, **loss_kwargs))
  ref1 = _ref_mesh_loss(out1, tgt1, img_res=img_res,
                        focal_length=focal_length, weights=weights)
  for k in losses1:
    np.testing.assert_allclose(np.asarray(losses1[k]), np.asarray(ref1[k]),
                               rtol=1e-3, atol=1e-5)

  # Case 2: non-multiple-of-8 batch exercising multi-tile masking, the
  # clamped ghost tile and the 2-core "parallel" split.
  out2, tgt2 = _make_inputs(jax.random.PRNGKey(1), B=20, V=64, J=8,
                            img_res=img_res)
  losses2 = jax.block_until_ready(
      mesh_loss(out2, tgt2, batch_tile=8, num_cores=2, **loss_kwargs))
  ref2 = _ref_mesh_loss(out2, tgt2, img_res=img_res,
                        focal_length=focal_length, weights=weights)
  for k in losses2:
    np.testing.assert_allclose(np.asarray(losses2[k]), np.asarray(ref2[k]),
                               rtol=1e-3, atol=1e-5)

  print("KERNEL_OK")
</pallas_src>

<mosaic_0001>
module attributes {stable_mosaic.version = 11 : i64} {
  func.func @mesh_loss_kernel(%arg0: i32, %arg1: i32, %arg2: memref<2x192xf32, #tpu.memory_space<vmem>>, %arg3: memref<2x192xf32, #tpu.memory_space<vmem>>, %arg4: memref<2x1xf32, #tpu.memory_space<vmem>>, %arg5: memref<2x1xf32, #tpu.memory_space<vmem>>, %arg6: memref<3x48xf32, #tpu.memory_space<vmem>>, %arg7: memref<9x48xf32, #tpu.memory_space<vmem>>, %arg8: memref<1x48xf32, #tpu.memory_space<vmem>>, %arg9: memref<2x10xf32, #tpu.memory_space<vmem>>, %arg10: memref<2x10xf32, #tpu.memory_space<vmem>>, %arg11: memref<3x2x8xf32, #tpu.memory_space<vmem>>, %arg12: memref<3x2x8xf32, #tpu.memory_space<vmem>>, %arg13: memref<2x8xf32, #tpu.memory_space<vmem>>, %arg14: memref<2x3xf32, #tpu.memory_space<vmem>>, %arg15: memref<2x2x8xf32, #tpu.memory_space<vmem>>, %arg16: memref<2x8xf32, #tpu.memory_space<vmem>>, %arg17: memref<1x1x8xf32, #tpu.memory_space<smem>>, %arg18: memref<2x1xf32, #tpu.memory_space<vmem>>) attributes {dimension_semantics = [#tpu.dimension_semantics<parallel>, #tpu.dimension_semantics<arbitrary>], iteration_bounds = array<i64: 1, 1>, scalar_prefetch = 0 : i64, scratch_operands = 1 : i64, tpu.core_type = #tpu.core_type<tc>, window_params = [{transform_indices = @transform_0, window_bounds = array<i64: 2, 192>}, {transform_indices = @transform_1, window_bounds = array<i64: 2, 192>}, {pipeline_mode = #tpu.pipeline_mode<synchronous>, transform_indices = @transform_2, window_bounds = array<i64: 2, 1>}, {pipeline_mode = #tpu.pipeline_mode<synchronous>, transform_indices = @transform_3, window_bounds = array<i64: 2, 1>}, {pipeline_mode = #tpu.pipeline_mode<synchronous>, transform_indices = @transform_4, window_bounds = array<i64: 3, 48>}, {pipeline_mode = #tpu.pipeline_mode<synchronous>, transform_indices = @transform_5, window_bounds = array<i64: 9, 48>}, {pipeline_mode = #tpu.pipeline_mode<synchronous>, transform_indices = @transform_6, window_bounds = array<i64: 1, 48>}, {pipeline_mode = #tpu.pipeline_mode<synchronous>, transform_indices = @transform_7, window_bounds = array<i64: 2, 10>}, {pipeline_mode = #tpu.pipeline_mode<synchronous>, transform_indices = @transform_8, window_bounds = array<i64: 2, 10>}, {pipeline_mode = #tpu.pipeline_mode<synchronous>, transform_indices = @transform_9, window_bounds = array<i64: 3, 2, 8>}, {pipeline_mode = #tpu.pipeline_mode<synchronous>, transform_indices = @transform_10, window_bounds = array<i64: 3, 2, 8>}, {pipeline_mode = #tpu.pipeline_mode<synchronous>, transform_indices = @transform_11, window_bounds = array<i64: 2, 8>}, {pipeline_mode = #tpu.pipeline_mode<synchronous>, transform_indices = @transform_12, window_bounds = array<i64: 2, 3>}, {pipeline_mode = #tpu.pipeline_mode<synchronous>, transform_indices = @transform_13, window_bounds = array<i64: 2, 2, 8>}, {pipeline_mode = #tpu.pipeline_mode<synchronous>, transform_indices = @transform_14, window_bounds = array<i64: 2, 8>}, {transform_indices = @transform_15, window_bounds = array<i64: 1, 1, 8>}]} {
    %c0_i32 = arith.constant 0 : i32
    %0 = arith.cmpi eq, %arg1, %c0_i32 : i32
    %1 = arith.extui %0 : i1 to i32
    %c0_i32_0 = arith.constant 0 : i32
    %2 = arith.cmpi ne, %1, %c0_i32_0 : i32
    scf.if %2 {
      %cst_14 = arith.constant 0.000000e+00 : f32
      %26 = vector.broadcast %cst_14 : f32 to vector<2x1xf32>
      %c0_15 = arith.constant 0 : index
      %c0_16 = arith.constant 0 : index
      %27 = vector.load %arg18[%c0_15, %c0_16] : memref<2x1xf32, #tpu.memory_space<vmem>>, vector<2x1xf32>
      tpu.vector_store %arg18[%c0_15, %c0_16], %26 {strides = array<i32>} : memref<2x1xf32, #tpu.memory_space<vmem>>, vector<2x1xf32>,
      %cst_17 = arith.constant 0.000000e+00 : f32
      %c0_18 = arith.constant 0 : index
      %c0_19 = arith.constant 0 : index
      %c0_20 = arith.constant 0 : index
      %28 = memref.load %arg17[%c0_18, %c0_19, %c0_20] : memref<1x1x8xf32, #tpu.memory_space<smem>>
      memref.store %cst_17, %arg17[%c0_18, %c0_19, %c0_20] : memref<1x1x8xf32, #tpu.memory_space<smem>>
      %cst_21 = arith.constant 0.000000e+00 : f32
      %c0_22 = arith.constant 0 : index
      %c0_23 = arith.constant 0 : index
      %c1 = arith.constant 1 : index
      %29 = memref.load %arg17[%c0_22, %c0_23, %c1] : memref<1x1x8xf32, #tpu.memory_space<smem>>
      memref.store %cst_21, %arg17[%c0_22, %c0_23, %c1] : memref<1x1x8xf32, #tpu.memory_space<smem>>
      %cst_24 = arith.constant 0.000000e+00 : f32
      %c0_25 = arith.constant 0 : index
      %c0_26 = arith.constant 0 : index
      %c2 = arith.constant 2 : index
      %30 = memref.load %arg17[%c0_25, %c0_26, %c2] : memref<1x1x8xf32, #tpu.memory_space<smem>>
      memref.store %cst_24, %arg17[%c0_25, %c0_26, %c2] : memref<1x1x8xf32, #tpu.memory_space<smem>>
      %cst_27 = arith.constant 0.000000e+00 : f32
      %c0_28 = arith.constant 0 : index
      %c0_29 = arith.constant 0 : index
      %c3 = arith.constant 3 : index
      %31 = memref.load %arg17[%c0_28, %c0_29, %c3] : memref<1x1x8xf32, #tpu.memory_space<smem>>
      memref.store %cst_27, %arg17[%c0_28, %c0_29, %c3] : memref<1x1x8xf32, #tpu.memory_space<smem>>
      %cst_30 = arith.constant 0.000000e+00 : f32
      %c0_31 = arith.constant 0 : index
      %c0_32 = arith.constant 0 : index
      %c4 = arith.constant 4 : index
      %32 = memref.load %arg17[%c0_31, %c0_32, %c4] : memref<1x1x8xf32, #tpu.memory_space<smem>>
      memref.store %cst_30, %arg17[%c0_31, %c0_32, %c4] : memref<1x1x8xf32, #tpu.memory_space<smem>>
      %cst_33 = arith.constant 0.000000e+00 : f32
      %c0_34 = arith.constant 0 : index
      %c0_35 = arith.constant 0 : index
      %c5 = arith.constant 5 : index
      %33 = memref.load %arg17[%c0_34, %c0_35, %c5] : memref<1x1x8xf32, #tpu.memory_space<smem>>
      memref.store %cst_33, %arg17[%c0_34, %c0_35, %c5] : memref<1x1x8xf32, #tpu.memory_space<smem>>
      %cst_36 = arith.constant 0.000000e+00 : f32
      %c0_37 = arith.constant 0 : index
      %c0_38 = arith.constant 0 : index
      %c6 = arith.constant 6 : index
      %34 = memref.load %arg17[%c0_37, %c0_38, %c6] : memref<1x1x8xf32, #tpu.memory_space<smem>>
      memref.store %cst_36, %arg17[%c0_37, %c0_38, %c6] : memref<1x1x8xf32, #tpu.memory_space<smem>>
      %cst_39 = arith.constant 0.000000e+00 : f32
      %c0_40 = arith.constant 0 : index
      %c0_41 = arith.constant 0 : index
      %c7 = arith.constant 7 : index
      %35 = memref.load %arg17[%c0_40, %c0_41, %c7] : memref<1x1x8xf32, #tpu.memory_space<smem>>
      memref.store %cst_39, %arg17[%c0_40, %c0_41, %c7] : memref<1x1x8xf32, #tpu.memory_space<smem>>
    } else {
    }
    %c0 = arith.constant 0 : index
    %c0_1 = arith.constant 0 : index
    %3 = vector.load %arg2[%c0, %c0_1] : memref<2x192xf32, #tpu.memory_space<vmem>>, vector<2x192xf32>
    %c0_2 = arith.constant 0 : index
    %c0_3 = arith.constant 0 : index
    %4 = vector.load %arg3[%c0_2, %c0_3] : memref<2x192xf32, #tpu.memory_space<vmem>>, vector<2x192xf32>
    %5 = arith.subf %3, %4 : vector<2x192xf32>
    %6 = math.absf %5 : vector<2x192xf32>
    %cst = arith.constant dense<0.000000e+00> : vector<2xf32>
    %7 = vector.multi_reduction <add>, %6, %cst [1] : vector<2x192xf32> to vector<2xf32>
    %8 = vector.shape_cast %7 : vector<2xf32> to vector<2x1xf32>
    %c1_i32 = arith.constant 1 : i32
    %9 = arith.muli %arg0, %c1_i32 : i32
    %10 = arith.addi %9, %arg1 : i32
    %c2_i32 = arith.constant 2 : i32
    %11 = arith.muli %10, %c2_i32 : i32
    %12 = arith.index_cast %11 : i32 to index
    %c0_4 = arith.constant 0 : index
    %13 = vector.load %arg4[%12, %c0_4] : memref<2x1xf32, #tpu.memory_space<vmem>>, vector<2x1xf32>
    %14 = arith.mulf %13, %8 : vector<2x1xf32>
    %c0_5 = arith.constant 0 : index
    %c0_6 = arith.constant 0 : index
    %15 = vector.load %arg18[%c0_5, %c0_6] : memref<2x1xf32, #tpu.memory_space<vmem>>, vector<2x1xf32>
    %16 = arith.addf %15, %14 : vector<2x1xf32>
    %c0_7 = arith.constant 0 : index
    %c0_8 = arith.constant 0 : index
    %17 = vector.load %arg18[%c0_7, %c0_8] : memref<2x1xf32, #tpu.memory_space<vmem>>, vector<2x1xf32>
    tpu.vector_store %arg18[%c0_7, %c0_8], %16 {strides = array<i32>} : memref<2x1xf32, #tpu.memory_space<vmem>>, vector<2x1xf32>,
    %c0_i32_9 = arith.constant 0 : i32
    %18 = arith.cmpi eq, %arg0, %c0_i32_9 : i32
    %c0_i32_10 = arith.constant 0 : i32
    %19 = arith.cmpi eq, %arg1, %c0_i32_10 : i32
    %20 = arith.andi %18, %19 : i1
    %21 = arith.extui %20 : i1 to i32
    %c0_i32_11 = arith.constant 0 : i32
    %22 = arith.cmpi ne, %21, %c0_i32_11 : i32
    scf.if %22 {
      %c0_14 = arith.constant 0 : index
      %c0_15 = arith.constant 0 : index
      %26 = vector.load %arg6[%c0_14, %c0_15] : memref<3x48xf32, #tpu.memory_space<vmem>>, vector<3x48xf32>
      %27 = vector.extract_strided_slice %26 {offsets = [0, 0], sizes = [1, 48], strides = [1, 1]} : vector<3x48xf32> to vector<1x48xf32>
      %28 = vector.extract_strided_slice %26 {offsets = [1, 0], sizes = [1, 48], strides = [1, 1]} : vector<3x48xf32> to vector<1x48xf32>
      %29 = vector.extract_strided_slice %26 {offsets = [2, 0], sizes = [1, 48], strides = [1, 1]} : vector<3x48xf32> to vector<1x48xf32>
      %cst_16 = arith.constant 9.99999993E-9 : f32
      %30 = vector.broadcast %cst_16 : f32 to vector<1x48xf32>
      %31 = arith.addf %27, %30 : vector<1x48xf32>
      %cst_17 = arith.constant 9.99999993E-9 : f32
      %32 = vector.broadcast %cst_17 : f32 to vector<1x48xf32>
      %33 = arith.addf %28, %32 : vector<1x48xf32>
      %cst_18 = arith.constant 9.99999993E-9 : f32
      %34 = vector.broadcast %cst_18 : f32 to vector<1x48xf32>
      %35 = arith.addf %29, %34 : vector<1x48xf32>
      %36 = arith.mulf %31, %31 : vector<1x48xf32>
      %37 = arith.mulf %33, %33 : vector<1x48xf32>
      %38 = arith.addf %36, %37 : vector<1x48xf32>
      %39 = arith.mulf %35, %35 : vector<1x48xf32>
      %40 = arith.addf %38, %39 : vector<1x48xf32>
      %41 = math.rsqrt %40 : vector<1x48xf32>
      %42 = arith.mulf %40, %41 : vector<1x48xf32>
      %cst_19 = arith.constant 5.000000e-01 : f32
      %43 = vector.broadcast %cst_19 : f32 to vector<1x48xf32>
      %44 = arith.mulf %43, %42 : vector<1x48xf32>
      %45 = math.cos %44 : vector<1x48xf32>
      %46 = math.sin %44 : vector<1x48xf32>
      %47 = arith.mulf %27, %41 : vector<1x48xf32>
      %48 = arith.mulf %46, %47 : vector<1x48xf32>
      %49 = arith.mulf %28, %41 : vector<1x48xf32>
      %50 = arith.mulf %46, %49 : vector<1x48xf32>
      %51 = arith.mulf %29, %41 : vector<1x48xf32>
      %52 = arith.mulf %46, %51 : vector<1x48xf32>
      %53 = arith.mulf %45, %45 : vector<1x48xf32>
      %54 = arith.mulf %48, %48 : vector<1x48xf32>
      %55 = arith.addf %53, %54 : vector<1x48xf32>
      %56 = arith.mulf %50, %50 : vector<1x48xf32>
      %57 = arith.addf %55, %56 : vector<1x48xf32>
      %58 = arith.mulf %52, %52 : vector<1x48xf32>
      %59 = arith.addf %57, %58 : vector<1x48xf32>
      %60 = math.rsqrt %59 : vector<1x48xf32>
      %61 = arith.mulf %45, %60 : vector<1x48xf32>
      %62 = arith.mulf %48, %60 : vector<1x48xf32>
      %63 = arith.mulf %50, %60 : vector<1x48xf32>
      %64 = arith.mulf %52, %60 : vector<1x48xf32>
      %65 = arith.mulf %61, %61 : vector<1x48xf32>
      %66 = arith.mulf %62, %62 : vector<1x48xf32>
      %67 = arith.mulf %63, %63 : vector<1x48xf32>
      %68 = arith.mulf %64, %64 : vector<1x48xf32>
      %69 = arith.mulf %61, %62 : vector<1x48xf32>
      %70 = arith.mulf %61, %63 : vector<1x48xf32>
      %71 = arith.mulf %61, %64 : vector<1x48xf32>
      %72 = arith.mulf %62, %63 : vector<1x48xf32>
      %73 = arith.mulf %62, %64 : vector<1x48xf32>
      %74 = arith.mulf %63, %64 : vector<1x48xf32>
      %75 = arith.addf %65, %66 : vector<1x48xf32>
      %76 = arith.subf %75, %67 : vector<1x48xf32>
      %77 = arith.subf %76, %68 : vector<1x48xf32>
      %cst_20 = arith.constant 2.000000e+00 : f32
      %78 = vector.broadcast %cst_20 : f32 to vector<1x48xf32>
      %79 = arith.mulf %78, %72 : vector<1x48xf32>
      %cst_21 = arith.constant 2.000000e+00 : f32
      %80 = vector.broadcast %cst_21 : f32 to vector<1x48xf32>
      %81 = arith.mulf %80, %71 : vector<1x48xf32>
      %82 = arith.subf %79, %81 : vector<1x48xf32>
      %cst_22 = arith.constant 2.000000e+00 : f32
      %83 = vector.broadcast %cst_22 : f32 to vector<1x48xf32>
      %84 = arith.mulf %83, %70 : vector<1x48xf32>
      %cst_23 = arith.constant 2.000000e+00 : f32
      %85 = vector.broadcast %cst_23 : f32 to vector<1x48xf32>
      %86 = arith.mulf %85, %73 : vector<1x48xf32>
      %87 = arith.addf %84, %86 : vector<1x48xf32>
      %cst_24 = arith.constant 2.000000e+00 : f32
      %88 = vector.broadcast %cst_24 : f32 to vector<1x48xf32>
      %89 = arith.mulf %88, %71 : vector<1x48xf32>
      %cst_25 = arith.constant 2.000000e+00 : f32
      %90 = vector.broadcast %cst_25 : f32 to vector<1x48xf32>
      %91 = arith.mulf %90, %72 : vector<1x48xf32>
      %92 = arith.addf %89, %91 : vector<1x48xf32>
      %93 = arith.subf %65, %66 : vector<1x48xf32>
      %94 = arith.addf %93, %67 : vector<1x48xf32>
      %95 = arith.subf %94, %68 : vector<1x48xf32>
      %cst_26 = arith.constant 2.000000e+00 : f32
      %96 = vector.broadcast %cst_26 : f32 to vector<1x48xf32>
      %97 = arith.mulf %96, %74 : vector<1x48xf32>
      %cst_27 = arith.constant 2.000000e+00 : f32
      %98 = vector.broadcast %cst_27 : f32 to vector<1x48xf32>
      %99 = arith.mulf %98, %69 : vector<1x48xf32>
      %100 = arith.subf %97, %99 : vector<1x48xf32>
      %cst_28 = arith.constant 2.000000e+00 : f32
      %101 = vector.broadcast %cst_28 : f32 to vector<1x48xf32>
      %102 = arith.mulf %101, %73 : vector<1x48xf32>
      %cst_29 = arith.constant 2.000000e+00 : f32
      %103 = vector.broadcast %cst_29 : f32 to vector<1x48xf32>
      %104 = arith.mulf %103, %70 : vector<1x48xf32>
      %105 = arith.subf %102, %104 : vector<1x48xf32>
      %cst_30 = arith.constant 2.000000e+00 : f32
      %106 = vector.broadcast %cst_30 : f32 to vector<1x48xf32>
      %107 = arith.mulf %106, %69 : vector<1x48xf32>
      %cst_31 = arith.constant 2.000000e+00 : f32
      %108 = vector.broadcast %cst_31 : f32 to vector<1x48xf32>
      %109 = arith.mulf %108, %74 : vector<1x48xf32>
      %110 = arith.addf %107, %109 : vector<1x48xf32>
      %111 = arith.subf %65, %66 : vector<1x48xf32>
      %112 = arith.subf %111, %67 : vector<1x48xf32>
      %113 = arith.addf %112, %68 : vector<1x48xf32>
      %c0_32 = arith.constant 0 : index
      %c0_33 = arith.constant 0 : index
      %114 = vector.load %arg7[%c0_32, %c0_33] : memref<9x48xf32, #tpu.memory_space<vmem>>, vector<9x48xf32>
      %115 = vector.extract_strided_slice %114 {offsets = [0, 0], sizes = [1, 48], strides = [1, 1]} : vector<9x48xf32> to vector<1x48xf32>
      %116 = arith.subf %115, %77 : vector<1x48xf32>
      %117 = arith.mulf %116, %116 : vector<1x48xf32>
      %118 = vector.extract_strided_slice %114 {offsets = [1, 0], sizes = [1, 48], strides = [1, 1]} : vector<9x48xf32> to vector<1x48xf32>
      %119 = arith.subf %118, %82 : vector<1x48xf32>
      %120 = arith.mulf %119, %119 : vector<1x48xf32>
      %121 = arith.addf %117, %120 : vector<1x48xf32>
      %122 = vector.extract_strided_slice %114 {offsets = [2, 0], sizes = [1, 48], strides = [1, 1]} : vector<9x48xf32> to vector<1x48xf32>
      %123 = arith.subf %122, %87 : vector<1x48xf32>
      %124 = arith.mulf %123, %123 : vector<1x48xf32>
      %125 = arith.addf %121, %124 : vector<1x48xf32>
      %126 = vector.extract_strided_slice %114 {offsets = [3, 0], sizes = [1, 48], strides = [1, 1]} : vector<9x48xf32> to vector<1x48xf32>
      %127 = arith.subf %126, %92 : vector<1x48xf32>
      %128 = arith.mulf %127, %127 : vector<1x48xf32>
      %129 = arith.addf %125, %128 : vector<1x48xf32>
      %130 = vector.extract_strided_slice %114 {offsets = [4, 0], sizes = [1, 48], strides = [1, 1]} : vector<9x48xf32> to vector<1x48xf32>
      %131 = arith.subf %130, %95 : vector<1x48xf32>
      %132 = arith.mulf %131, %131 : vector<1x48xf32>
      %133 = arith.addf %129, %132 : vector<1x48xf32>
      %134 = vector.extract_strided_slice %114 {offsets = [5, 0], sizes = [1, 48], strides = [1, 1]} : vector<9x48xf32> to vector<1x48xf32>
      %135 = arith.subf %134, %100 : vector<1x48xf32>
      %136 = arith.mulf %135, %135 : vector<1x48xf32>
      %137 = arith.addf %133, %136 : vector<1x48xf32>
      %138 = vector.extract_strided_slice %114 {offsets = [6, 0], sizes = [1, 48], strides = [1, 1]} : vector<9x48xf32> to vector<1x48xf32>
      %139 = arith.subf %138, %105 : vector<1x48xf32>
      %140 = arith.mulf %139, %139 : vector<1x48xf32>
      %141 = arith.addf %137, %140 : vector<1x48xf32>
      %142 = vector.extract_strided_slice %114 {offsets = [7, 0], sizes = [1, 48], strides = [1, 1]} : vector<9x48xf32> to vector<1x48xf32>
      %143 = arith.subf %142, %110 : vector<1x48xf32>
      %144 = arith.mulf %143, %143 : vector<1x48xf32>
      %145 = arith.addf %141, %144 : vector<1x48xf32>
      %146 = vector.extract_strided_slice %114 {offsets = [8, 0], sizes = [1, 48], strides = [1, 1]} : vector<9x48xf32> to vector<1x48xf32>
      %147 = arith.subf %146, %113 : vector<1x48xf32>
      %148 = arith.mulf %147, %147 : vector<1x48xf32>
      %149 = arith.addf %145, %148 : vector<1x48xf32>
      %c0_34 = arith.constant 0 : index
      %c0_35 = arith.constant 0 : index
      %150 = vector.load %arg8[%c0_34, %c0_35] : memref<1x48xf32, #tpu.memory_space<vmem>>, vector<1x48xf32>
      %151 = arith.mulf %150, %149 : vector<1x48xf32>
      %152 = vector.shape_cast %151 : vector<1x48xf32> to vector<1x1x48xf32>
      %cst_36 = arith.constant dense<0.000000e+00> : vector<1xf32>
      %153 = vector.multi_reduction <add>, %152, %cst_36 [1, 2] : vector<1x1x48xf32> to vector<1xf32>
      %154 = vector.shape_cast %153 : vector<1xf32> to vector<1x1x1xf32>
      %155 = vector.extract %154[0, 0, 0] : f32 from vector<1x1x1xf32>
      %c0_37 = arith.constant 0 : index
      %c0_38 = arith.constant 0 : index
      %156 = vector.load %arg9[%c0_37, %c0_38] : memref<2x10xf32, #tpu.memory_space<vmem>>, vector<2x10xf32>
      %c0_39 = arith.constant 0 : index
      %c0_40 = arith.constant 0 : index
      %157 = vector.load %arg10[%c0_39, %c0_40] : memref<2x10xf32, #tpu.memory_space<vmem>>, vector<2x10xf32>
      %158 = arith.subf %156, %157 : vector<2x10xf32>
      %c0_41 = arith.constant 0 : index
      %c0_42 = arith.constant 0 : index
      %159 = vector.load %arg5[%c0_41, %c0_42] : memref<2x1xf32, #tpu.memory_space<vmem>>, vector<2x1xf32>
      %160 = arith.mulf %158, %158 : vector<2x10xf32>
      %cst_43 = arith.constant dense<0.000000e+00> : vector<2xf32>
      %161 = vector.multi_reduction <add>, %160, %cst_43 [1] : vector<2x10xf32> to vector<2xf32>
      %162 = vector.shape_cast %161 : vector<2xf32> to vector<2x1xf32>
      %163 = arith.mulf %159, %162 : vector<2x1xf32>
      %164 = vector.shape_cast %163 : vector<2x1xf32> to vector<1x2x1xf32>
      %cst_44 = arith.constant dense<0.000000e+00> : vector<1xf32>
      %165 = vector.multi_reduction <add>, %164, %cst_44 [1, 2] : vector<1x2x1xf32> to vector<1xf32>
      %166 = vector.shape_cast %165 : vector<1xf32> to vector<1x1x1xf32>
      %167 = vector.extract %166[0, 0, 0] : f32 from vector<1x1x1xf32>
      %c0_45 = arith.constant 0 : index
      %c0_46 = arith.constant 0 : index
      %168 = vector.load %arg13[%c0_45, %c0_46] : memref<2x8xf32, #tpu.memory_space<vmem>>, vector<2x8xf32>
      %c0_47 = arith.constant 0 : index
      %c0_48 = arith.constant 0 : index
      %c0_49 = arith.constant 0 : index
      %169 = vector.load %arg11[%c0_47, %c0_48, %c0_49] : memref<3x2x8xf32, #tpu.memory_space<vmem>>, vector<1x2x8xf32>
      %170 = vector.shape_cast %169 : vector<1x2x8xf32> to vector<2x8xf32>
      %c0_50 = arith.constant 0 : index
      %c0_51 = arith.constant 0 : index
      %c0_52 = arith.constant 0 : index
      %171 = vector.load %arg12[%c0_50, %c0_51, %c0_52] : memref<3x2x8xf32, #tpu.memory_space<vmem>>, vector<1x2x8xf32>
      %172 = vector.shape_cast %171 : vector<1x2x8xf32> to vector<2x8xf32>
      %173 = vector.extract_strided_slice %170 {offsets = [0, 2], sizes = [2, 1], strides = [1, 1]} : vector<2x8xf32> to vector<2x1xf32>
      %174 = vector.extract_strided_slice %170 {offsets = [0, 3], sizes = [2, 1], strides = [1, 1]} : vector<2x8xf32> to vector<2x1xf32>
      %175 = arith.addf %173, %174 : vector<2x1xf32>
      %cst_53 = arith.constant 5.000000e-01 : f32
      %176 = vector.broadcast %cst_53 : f32 to vector<2x1xf32>
      %177 = arith.mulf %175, %176 : vector<2x1xf32>
      %178 = vector.extract_strided_slice %172 {offsets = [0, 2], sizes = [2, 1], strides = [1, 1]} : vector<2x8xf32> to vector<2x1xf32>
      %179 = vector.extract_strided_slice %172 {offsets = [0, 3], sizes = [2, 1], strides = [1, 1]} : vector<2x8xf32> to vector<2x1xf32>
      %180 = arith.addf %178, %179 : vector<2x1xf32>
      %cst_54 = arith.constant 5.000000e-01 : f32
      %181 = vector.broadcast %cst_54 : f32 to vector<2x1xf32>
      %182 = arith.mulf %180, %181 : vector<2x1xf32>
      %183 = vector.broadcast %177 : vector<2x1xf32> to vector<2x8xf32>
      %184 = arith.subf %170, %183 : vector<2x8xf32>
      %185 = vector.broadcast %182 : vector<2x1xf32> to vector<2x8xf32>
      %186 = arith.subf %172, %185 : vector<2x8xf32>
      %187 = arith.subf %184, %186 : vector<2x8xf32>
      %188 = math.absf %187 : vector<2x8xf32>
      %cst_55 = arith.constant 1.000000e+00 : f32
      %189 = vector.broadcast %cst_55 : f32 to vector<2x8xf32>
      %190 = arith.cmpf olt, %188, %189 : vector<2x8xf32>
      %cst_56 = arith.constant 5.000000e-01 : f32
      %191 = vector.broadcast %cst_56 : f32 to vector<2x8xf32>
      %192 = arith.mulf %191, %187 : vector<2x8xf32>
      %193 = arith.mulf %192, %187 : vector<2x8xf32>
      %cst_57 = arith.constant 5.000000e-01 : f32
      %194 = vector.broadcast %cst_57 : f32 to vector<2x8xf32>
      %195 = arith.subf %188, %194 : vector<2x8xf32>
      %196 = arith.select %190, %193, %195 : vector<2x8xi1>, vector<2x8xf32>
      %c1 = arith.constant 1 : index
      %c0_58 = arith.constant 0 : index
      %c0_59 = arith.constant 0 : index
      %197 = vector.load %arg11[%c1, %c0_58, %c0_59] : memref<3x2x8xf32, #tpu.memory_space<vmem>>, vector<1x2x8xf32>
      %198 = vector.shape_cast %197 : vector<1x2x8xf32> to vector<2x8xf32>
      %c1_60 = arith.constant 1 : index
      %c0_61 = arith.constant 0 : index
      %c0_62 = arith.constant 0 : index
      %199 = vector.load %arg12[%c1_60, %c0_61, %c0_62] : memref<3x2x8xf32, #tpu.memory_space<vmem>>, vector<1x2x8xf32>
      %200 = vector.shape_cast %199 : vector<1x2x8xf32> to vector<2x8xf32>
      %201 = vector.extract_strided_slice %198 {offsets = [0, 2], sizes = [2, 1], strides = [1, 1]} : vector<2x8xf32> to vector<2x1xf32>
      %202 = vector.extract_strided_slice %198 {offsets = [0, 3], sizes = [2, 1], strides = [1, 1]} : vector<2x8xf32> to vector<2x1xf32>
      %203 = arith.addf %201, %202 : vector<2x1xf32>
      %cst_63 = arith.constant 5.000000e-01 : f32
      %204 = vector.broadcast %cst_63 : f32 to vector<2x1xf32>
      %205 = arith.mulf %203, %204 : vector<2x1xf32>
      %206 = vector.extract_strided_slice %200 {offsets = [0, 2], sizes = [2, 1], strides = [1, 1]} : vector<2x8xf32> to vector<2x1xf32>
      %207 = vector.extract_strided_slice %200 {offsets = [0, 3], sizes = [2, 1], strides = [1, 1]} : vector<2x8xf32> to vector<2x1xf32>
      %208 = arith.addf %206, %207 : vector<2x1xf32>
      %cst_64 = arith.constant 5.000000e-01 : f32
      %209 = vector.broadcast %cst_64 : f32 to vector<2x1xf32>
      %210 = arith.mulf %208, %209 : vector<2x1xf32>
      %211 = vector.broadcast %205 : vector<2x1xf32> to vector<2x8xf32>
      %212 = arith.subf %198, %211 : vector<2x8xf32>
      %213 = vector.broadcast %210 : vector<2x1xf32> to vector<2x8xf32>
      %214 = arith.subf %200, %213 : vector<2x8xf32>
      %215 = arith.subf %212, %214 : vector<2x8xf32>
      %216 = math.absf %215 : vector<2x8xf32>
      %cst_65 = arith.constant 1.000000e+00 : f32
      %217 = vector.broadcast %cst_65 : f32 to vector<2x8xf32>
      %218 = arith.cmpf olt, %216, %217 : vector<2x8xf32>
      %cst_66 = arith.constant 5.000000e-01 : f32
      %219 = vector.broadcast %cst_66 : f32 to vector<2x8xf32>
      %220 = arith.mulf %219, %215 : vector<2x8xf32>
      %221 = arith.mulf %220, %215 : vector<2x8xf32>
      %cst_67 = arith.constant 5.000000e-01 : f32
      %222 = vector.broadcast %cst_67 : f32 to vector<2x8xf32>
      %223 = arith.subf %216, %222 : vector<2x8xf32>
      %224 = arith.select %218, %221, %223 : vector<2x8xi1>, vector<2x8xf32>
      %225 = arith.addf %196, %224 : vector<2x8xf32>
      %c2 = arith.constant 2 : index
      %c0_68 = arith.constant 0 : index
      %c0_69 = arith.constant 0 : index
      %226 = vector.load %arg11[%c2, %c0_68, %c0_69] : memref<3x2x8xf32, #tpu.memory_space<vmem>>, vector<1x2x8xf32>
      %227 = vector.shape_cast %226 : vector<1x2x8xf32> to vector<2x8xf32>
      %c2_70 = arith.constant 2 : index
      %c0_71 = arith.constant 0 : index
      %c0_72 = arith.constant 0 : index
      %228 = vector.load %arg12[%c2_70, %c0_71, %c0_72] : memref<3x2x8xf32, #tpu.memory_space<vmem>>, vector<1x2x8xf32>
      %229 = vector.shape_cast %228 : vector<1x2x8xf32> to vector<2x8xf32>
      %230 = vector.extract_strided_slice %227 {offsets = [0, 2], sizes = [2, 1], strides = [1, 1]} : vector<2x8xf32> to vector<2x1xf32>
      %231 = vector.extract_strided_slice %227 {offsets = [0, 3], sizes = [2, 1], strides = [1, 1]} : vector<2x8xf32> to vector<2x1xf32>
      %232 = arith.addf %230, %231 : vector<2x1xf32>
      %cst_73 = arith.constant 5.000000e-01 : f32
      %233 = vector.broadcast %cst_73 : f32 to vector<2x1xf32>
      %234 = arith.mulf %232, %233 : vector<2x1xf32>
      %235 = vector.extract_strided_slice %229 {offsets = [0, 2], sizes = [2, 1], strides = [1, 1]} : vector<2x8xf32> to vector<2x1xf32>
      %236 = vector.extract_strided_slice %229 {offsets = [0, 3], sizes = [2, 1], strides = [1, 1]} : vector<2x8xf32> to vector<2x1xf32>
      %237 = arith.addf %235, %236 : vector<2x1xf32>
      %cst_74 = arith.constant 5.000000e-01 : f32
      %238 = vector.broadcast %cst_74 : f32 to vector<2x1xf32>
      %239 = arith.mulf %237, %238 : vector<2x1xf32>
      %240 = vector.broadcast %234 : vector<2x1xf32> to vector<2x8xf32>
      %241 = arith.subf %227, %240 : vector<2x8xf32>
      %242 = vector.broadcast %239 : vector<2x1xf32> to vector<2x8xf32>
      %243 = arith.subf %229, %242 : vector<2x8xf32>
      %244 = arith.subf %241, %243 : vector<2x8xf32>
      %245 = math.absf %244 : vector<2x8xf32>
      %cst_75 = arith.constant 1.000000e+00 : f32
      %246 = vector.broadcast %cst_75 : f32 to vector<2x8xf32>
      %247 = arith.cmpf olt, %245, %246 : vector<2x8xf32>
      %cst_76 = arith.constant 5.000000e-01 : f32
      %248 = vector.broadcast %cst_76 : f32 to vector<2x8xf32>
      %249 = arith.mulf %248, %244 : vector<2x8xf32>
      %250 = arith.mulf %249, %244 : vector<2x8xf32>
      %cst_77 = arith.constant 5.000000e-01 : f32
      %251 = vector.broadcast %cst_77 : f32 to vector<2x8xf32>
      %252 = arith.subf %245, %251 : vector<2x8xf32>
      %253 = arith.select %247, %250, %252 : vector<2x8xi1>, vector<2x8xf32>
      %254 = arith.addf %225, %253 : vector<2x8xf32>
      %255 = arith.mulf %168, %254 : vector<2x8xf32>
      %256 = vector.shape_cast %255 : vector<2x8xf32> to vector<1x2x8xf32>
      %cst_78 = arith.constant dense<0.000000e+00> : vector<1xf32>
      %257 = vector.multi_reduction <add>, %256, %cst_78 [1, 2] : vector<1x2x8xf32> to vector<1xf32>
      %258 = vector.shape_cast %257 : vector<1xf32> to vector<1x1x1xf32>
      %259 = vector.extract %258[0, 0, 0] : f32 from vector<1x1x1xf32>
      %c0_79 = arith.constant 0 : index
      %c0_80 = arith.constant 0 : index
      %260 = vector.load %arg14[%c0_79, %c0_80] : memref<2x3xf32, #tpu.memory_space<vmem>>, vector<2x3xf32>
      %261 = vector.extract_strided_slice %260 {offsets = [0, 0], sizes = [2, 1], strides = [1, 1]} : vector<2x3xf32> to vector<2x1xf32>
      %262 = vector.extract_strided_slice %260 {offsets = [0, 1], sizes = [2, 1], strides = [1, 1]} : vector<2x3xf32> to vector<2x1xf32>
      %263 = vector.extract_strided_slice %260 {offsets = [0, 2], sizes = [2, 1], strides = [1, 1]} : vector<2x3xf32> to vector<2x1xf32>
      %cst_81 = arith.constant 1.600000e+01 : f32
      %264 = vector.broadcast %cst_81 : f32 to vector<2x1xf32>
      %265 = arith.mulf %264, %261 : vector<2x1xf32>
      %cst_82 = arith.constant 9.99999971E-10 : f32
      %266 = vector.broadcast %cst_82 : f32 to vector<2x1xf32>
      %267 = arith.addf %265, %266 : vector<2x1xf32>
      %cst_83 = arith.constant 1.000000e+04 : f32
      %268 = vector.broadcast %cst_83 : f32 to vector<2x1xf32>
      %269 = arith.divf %268, %267 : vector<2x1xf32>
      %c0_84 = arith.constant 0 : index
      %c0_85 = arith.constant 0 : index
      %c0_86 = arith.constant 0 : index
      %270 = vector.load %arg11[%c0_84, %c0_85, %c0_86] : memref<3x2x8xf32, #tpu.memory_space<vmem>>, vector<1x2x8xf32>
      %271 = vector.shape_cast %270 : vector<1x2x8xf32> to vector<2x8xf32>
      %272 = vector.broadcast %262 : vector<2x1xf32> to vector<2x8xf32>
      %273 = arith.addf %271, %272 : vector<2x8xf32>
      %c1_87 = arith.constant 1 : index
      %c0_88 = arith.constant 0 : index
      %c0_89 = arith.constant 0 : index
      %274 = vector.load %arg11[%c1_87, %c0_88, %c0_89] : memref<3x2x8xf32, #tpu.memory_space<vmem>>, vector<1x2x8xf32>
      %275 = vector.shape_cast %274 : vector<1x2x8xf32> to vector<2x8xf32>
      %276 = vector.broadcast %263 : vector<2x1xf32> to vector<2x8xf32>
      %277 = arith.addf %275, %276 : vector<2x8xf32>
      %c2_90 = arith.constant 2 : index
      %c0_91 = arith.constant 0 : index
      %c0_92 = arith.constant 0 : index
      %278 = vector.load %arg11[%c2_90, %c0_91, %c0_92] : memref<3x2x8xf32, #tpu.memory_space<vmem>>, vector<1x2x8xf32>
      %279 = vector.shape_cast %278 : vector<1x2x8xf32> to vector<2x8xf32>
      %280 = vector.broadcast %269 : vector<2x1xf32> to vector<2x8xf32>
      %281 = arith.addf %279, %280 : vector<2x8xf32>
      %cst_93 = arith.constant 1.000000e+00 : f32
      %282 = vector.broadcast %cst_93 : f32 to vector<2x8xf32>
      %283 = arith.divf %282, %281 : vector<2x8xf32>
      %284 = arith.mulf %273, %283 : vector<2x8xf32>
      %cst_94 = arith.constant 666.666687 : f32
      %285 = vector.broadcast %cst_94 : f32 to vector<2x8xf32>
      %286 = arith.mulf %285, %284 : vector<2x8xf32>
      %287 = arith.mulf %277, %283 : vector<2x8xf32>
      %cst_95 = arith.constant 666.666687 : f32
      %288 = vector.broadcast %cst_95 : f32 to vector<2x8xf32>
      %289 = arith.mulf %288, %287 : vector<2x8xf32>
      %c0_96 = arith.constant 0 : index
      %c0_97 = arith.constant 0 : index
      %c0_98 = arith.constant 0 : index
      %290 = vector.load %arg15[%c0_96, %c0_97, %c0_98] : memref<2x2x8xf32, #tpu.memory_space<vmem>>, vector<1x2x8xf32>
      %291 = vector.shape_cast %290 : vector<1x2x8xf32> to vector<2x8xf32>
      %cst_99 = arith.constant 0.13333334 : f32
      %292 = vector.broadcast %cst_99 : f32 to vector<2x8xf32>
      %293 = arith.mulf %291, %292 : vector<2x8xf32>
      %cst_100 = arith.constant 1.000000e+00 : f32
      %294 = vector.broadcast %cst_100 : f32 to vector<2x8xf32>
      %295 = arith.subf %293, %294 : vector<2x8xf32>
      %c1_101 = arith.constant 1 : index
      %c0_102 = arith.constant 0 : index
      %c0_103 = arith.constant 0 : index
      %296 = vector.load %arg15[%c1_101, %c0_102, %c0_103] : memref<2x2x8xf32, #tpu.memory_space<vmem>>, vector<1x2x8xf32>
      %297 = vector.shape_cast %296 : vector<1x2x8xf32> to vector<2x8xf32>
      %cst_104 = arith.constant 0.13333334 : f32
      %298 = vector.broadcast %cst_104 : f32 to vector<2x8xf32>
      %299 = arith.mulf %297, %298 : vector<2x8xf32>
      %cst_105 = arith.constant 1.000000e+00 : f32
      %300 = vector.broadcast %cst_105 : f32 to vector<2x8xf32>
      %301 = arith.subf %299, %300 : vector<2x8xf32>
      %c0_106 = arith.constant 0 : index
      %c0_107 = arith.constant 0 : index
      %302 = vector.load %arg16[%c0_106, %c0_107] : memref<2x8xf32, #tpu.memory_space<vmem>>, vector<2x8xf32>
      %303 = arith.subf %286, %295 : vector<2x8xf32>
      %304 = math.absf %303 : vector<2x8xf32>
      %cst_108 = arith.constant 1.000000e+00 : f32
      %305 = vector.broadcast %cst_108 : f32 to vector<2x8xf32>
      %306 = arith.cmpf olt, %304, %305 : vector<2x8xf32>
      %cst_109 = arith.constant 5.000000e-01 : f32
      %307 = vector.broadcast %cst_109 : f32 to vector<2x8xf32>
      %308 = arith.mulf %307, %303 : vector<2x8xf32>
      %309 = arith.mulf %308, %303 : vector<2x8xf32>
      %cst_110 = arith.constant 5.000000e-01 : f32
      %310 = vector.broadcast %cst_110 : f32 to vector<2x8xf32>
      %311 = arith.subf %304, %310 : vector<2x8xf32>
      %312 = arith.select %306, %309, %311 : vector<2x8xi1>, vector<2x8xf32>
      %313 = arith.subf %289, %301 : vector<2x8xf32>
      %314 = math.absf %313 : vector<2x8xf32>
      %cst_111 = arith.constant 1.000000e+00 : f32
      %315 = vector.broadcast %cst_111 : f32 to vector<2x8xf32>
      %316 = arith.cmpf olt, %314, %315 : vector<2x8xf32>
      %cst_112 = arith.constant 5.000000e-01 : f32
      %317 = vector.broadcast %cst_112 : f32 to vector<2x8xf32>
      %318 = arith.mulf %317, %313 : vector<2x8xf32>
      %319 = arith.mulf %318, %313 : vector<2x8xf32>
      %cst_113 = arith.constant 5.000000e-01 : f32
      %320 = vector.broadcast %cst_113 : f32 to vector<2x8xf32>
      %321 = arith.subf %314, %320 : vector<2x8xf32>
      %322 = arith.select %316, %319, %321 : vector<2x8xi1>, vector<2x8xf32>
      %323 = arith.addf %312, %322 : vector<2x8xf32>
      %324 = arith.mulf %302, %323 : vector<2x8xf32>
      %325 = vector.shape_cast %324 : vector<2x8xf32> to vector<1x2x8xf32>
      %cst_114 = arith.constant dense<0.000000e+00> : vector<1xf32>
      %326 = vector.multi_reduction <add>, %325, %cst_114 [1, 2] : vector<1x2x8xf32> to vector<1xf32>
      %327 = vector.shape_cast %326 : vector<1xf32> to vector<1x1x1xf32>
      %328 = vector.extract %327[0, 0, 0] : f32 from vector<1x1x1xf32>
      %cst_115 = arith.constant 0.00231481483 : f32
      %329 = arith.mulf %155, %cst_115 : f32
      %c0_116 = arith.constant 0 : index
      %c0_117 = arith.constant 0 : index
      %c1_118 = arith.constant 1 : index
      %330 = memref.load %arg17[%c0_116, %c0_117, %c1_118] : memref<1x1x8xf32, #tpu.memory_space<smem>>
      memref.store %329, %arg17[%c0_116, %c0_117, %c1_118] : memref<1x1x8xf32, #tpu.memory_space<smem>>
      %cst_119 = arith.constant 5.000000e-03 : f32
      %331 = arith.mulf %167, %cst_119 : f32
      %c0_120 = arith.constant 0 : index
      %c0_121 = arith.constant 0 : index
      %c2_122 = arith.constant 2 : index
      %332 = memref.load %arg17[%c0_120, %c0_121, %c2_122] : memref<1x1x8xf32, #tpu.memory_space<smem>>
      memref.store %331, %arg17[%c0_120, %c0_121, %c2_122] : memref<1x1x8xf32, #tpu.memory_space<smem>>
      %cst_123 = arith.constant 0.020833334 : f32
      %333 = arith.mulf %259, %cst_123 : f32
      %c0_124 = arith.constant 0 : index
      %c0_125 = arith.constant 0 : index
      %c3 = arith.constant 3 : index
      %334 = memref.load %arg17[%c0_124, %c0_125, %c3] : memref<1x1x8xf32, #tpu.memory_space<smem>>
      memref.store %333, %arg17[%c0_124, %c0_125, %c3] : memref<1x1x8xf32, #tpu.memory_space<smem>>
      %cst_126 = arith.constant 3.125000e-02 : f32
      %335 = arith.mulf %328, %cst_126 : f32
      %c0_127 = arith.constant 0 : index
      %c0_128 = arith.constant 0 : index
      %c4 = arith.constant 4 : index
      %336 = memref.load %arg17[%c0_127, %c0_128, %c4] : memref<1x1x8xf32, #tpu.memory_space<smem>>
      memref.store %335, %arg17[%c0_127, %c0_128, %c4] : memref<1x1x8xf32, #tpu.memory_space<smem>>
    } else {
    }
    %c0_i32_12 = arith.constant 0 : i32
    %23 = arith.cmpi eq, %arg1, %c0_i32_12 : i32
    %24 = arith.extui %23 : i1 to i32
    %c0_i32_13 = arith.constant 0 : i32
    %25 = arith.cmpi ne, %24, %c0_i32_13 : i32
    scf.if %25 {
      %c0_14 = arith.constant 0 : index
      %c0_15 = arith.constant 0 : index
      %26 = vector.load %arg18[%c0_14, %c0_15] : memref<2x1xf32, #tpu.memory_space<vmem>>, vector<2x1xf32>
      %27 = vector.shape_cast %26 : vector<2x1xf32> to vector<1x2x1xf32>
      %cst_16 = arith.constant dense<0.000000e+00> : vector<1xf32>
      %28 = vector.multi_reduction <add>, %27, %cst_16 [1, 2] : vector<1x2x1xf32> to vector<1xf32>
      %29 = vector.shape_cast %28 : vector<1xf32> to vector<1x1x1xf32>
      %30 = vector.extract %29[0, 0, 0] : f32 from vector<1x1x1xf32>
      %cst_17 = arith.constant 0.00260416674 : f32
      %31 = arith.mulf %30, %cst_17 : f32
      %c0_18 = arith.constant 0 : index
      %c0_19 = arith.constant 0 : index
      %c0_20 = arith.constant 0 : index
      %32 = memref.load %arg17[%c0_18, %c0_19, %c0_20] : memref<1x1x8xf32, #tpu.memory_space<smem>>
      memref.store %31, %arg17[%c0_18, %c0_19, %c0_20] : memref<1x1x8xf32, #tpu.memory_space<smem>>
    } else {
    }
    return
  }
  func.func @transform_0(%arg0: i32, %arg1: i32) -> (i32, i32) {
    %c1_i32 = arith.constant 1 : i32
    %0 = arith.muli %arg0, %c1_i32 : i32
    %1 = arith.addi %0, %arg1 : i32
    %c0_i32 = arith.constant 0 : i32
    %c0_i32_0 = arith.constant 0 : i32
    return %1, %c0_i32 : i32, i32
  }
  func.func @transform_1(%arg0: i32, %arg1: i32) -> (i32, i32) {
    %c1_i32 = arith.constant 1 : i32
    %0 = arith.muli %arg0, %c1_i32 : i32
    %1 = arith.addi %0, %arg1 : i32
    %c0_i32 = arith.constant 0 : i32
    %c0_i32_0 = arith.constant 0 : i32
    return %1, %c0_i32 : i32, i32
  }
  func.func @transform_2(%arg0: i32, %arg1: i32) -> (i32, i32) {
    %c0_i32 = arith.constant 0 : i32
    %c0_i32_0 = arith.constant 0 : i32
    %c0_i32_1 = arith.constant 0 : i32
    return %c0_i32, %c0_i32_0 : i32, i32
  }
  func.func @transform_3(%arg0: i32, %arg1: i32) -> (i32, i32) {
    %c0_i32 = arith.constant 0 : i32
    %c0_i32_0 = arith.constant 0 : i32
    %c0_i32_1 = arith.constant 0 : i32
    return %c0_i32, %c0_i32_0 : i32, i32
  }
  func.func @transform_4(%arg0: i32, %arg1: i32) -> (i32, i32) {
    %c0_i32 = arith.constant 0 : i32
    %c0_i32_0 = arith.constant 0 : i32
    %c0_i32_1 = arith.constant 0 : i32
    return %c0_i32, %c0_i32_0 : i32, i32
  }
  func.func @transform_5(%arg0: i32, %arg1: i32) -> (i32, i32) {
    %c0_i32 = arith.constant 0 : i32
    %c0_i32_0 = arith.constant 0 : i32
    %c0_i32_1 = arith.constant 0 : i32
    return %c0_i32, %c0_i32_0 : i32, i32
  }
  func.func @transform_6(%arg0: i32, %arg1: i32) -> (i32, i32) {
    %c0_i32 = arith.constant 0 : i32
    %c0_i32_0 = arith.constant 0 : i32
    %c0_i32_1 = arith.constant 0 : i32
    return %c0_i32, %c0_i32_0 : i32, i32
  }
  func.func @transform_7(%arg0: i32, %arg1: i32) -> (i32, i32) {
    %c0_i32 = arith.constant 0 : i32
    %c0_i32_0 = arith.constant 0 : i32
    %c0_i32_1 = arith.constant 0 : i32
    return %c0_i32, %c0_i32_0 : i32, i32
  }
  func.func @transform_8(%arg0: i32, %arg1: i32) -> (i32, i32) {
    %c0_i32 = arith.constant 0 : i32
    %c0_i32_0 = arith.constant 0 : i32
    %c0_i32_1 = arith.constant 0 : i32
    return %c0_i32, %c0_i32_0 : i32, i32
  }
  func.func @transform_9(%arg0: i32, %arg1: i32) -> (i32, i32, i32) {
    %c0_i32 = arith.constant 0 : i32
    %c0_i32_0 = arith.constant 0 : i32
    %c0_i32_1 = arith.constant 0 : i32
    %c0_i32_2 = arith.constant 0 : i32
    return %c0_i32, %c0_i32_0, %c0_i32_1 : i32, i32, i32
  }
  func.func @transform_10(%arg0: i32, %arg1: i32) -> (i32, i32, i32) {
    %c0_i32 = arith.constant 0 : i32
    %c0_i32_0 = arith.constant 0 : i32
    %c0_i32_1 = arith.constant 0 : i32
    %c0_i32_2 = arith.constant 0 : i32
    return %c0_i32, %c0_i32_0, %c0_i32_1 : i32, i32, i32
  }
  func.func @transform_11(%arg0: i32, %arg1: i32) -> (i32, i32) {
    %c0_i32 = arith.constant 0 : i32
    %c0_i32_0 = arith.constant 0 : i32
    %c0_i32_1 = arith.constant 0 : i32
    return %c0_i32, %c0_i32_0 : i32, i32
  }
  func.func @transform_12(%arg0: i32, %arg1: i32) -> (i32, i32) {
    %c0_i32 = arith.constant 0 : i32
    %c0_i32_0 = arith.constant 0 : i32
    %c0_i32_1 = arith.constant 0 : i32
    return %c0_i32, %c0_i32_0 : i32, i32
  }
  func.func @transform_13(%arg0: i32, %arg1: i32) -> (i32, i32, i32) {
    %c0_i32 = arith.constant 0 : i32
    %c0_i32_0 = arith.constant 0 : i32
    %c0_i32_1 = arith.constant 0 : i32
    %c0_i32_2 = arith.constant 0 : i32
    return %c0_i32, %c0_i32_0, %c0_i32_1 : i32, i32, i32
  }
  func.func @transform_14(%arg0: i32, %arg1: i32) -> (i32, i32) {
    %c0_i32 = arith.constant 0 : i32
    %c0_i32_0 = arith.constant 0 : i32
    %c0_i32_1 = arith.constant 0 : i32
    return %c0_i32, %c0_i32_0 : i32, i32
  }
  func.func @transform_15(%arg0: i32, %arg1: i32) -> (i32, i32, i32) {
    %c0_i32 = arith.constant 0 : i32
    %c0_i32_0 = arith.constant 0 : i32
    %c0_i32_1 = arith.constant 0 : i32
    return %arg0, %c0_i32, %c0_i32_0 : i32, i32, i32
  }
}

</mosaic_0001>

<bundles_post_ra>
// kernel: tpu_custom_call.1
= control target key start
LH: loop header
LB: loop body
LE: loop exit
PB: predicated region body
PF: predicated region fallthrough
CT: control target
= control target key end

     0   :  { %20 = vsyncpa [#allocation4], 0  ;;  %s1255_s0 = inlined_call_operand.hbm [shape: f32[2,192], index: 0, kind: input, shape index: {}]   ;;  %s1256_s1 = inlined_call_operand.hbm [shape: f32[2,192], index: 1, kind: input, shape index: {}]   ;;  %s1257_s2 = inlined_call_operand.vmem [shape: f32[2,1], index: 2, kind: input, shape index: {}]   ;;  %s1258_s3 = inlined_call_operand.vmem [shape: f32[2,1], index: 3, kind: input, shape index: {}]   ;;  %s1259_s4 = inlined_call_operand.hbm [shape: f32[3,48], index: 4, kind: input, shape index: {}]   ;;  %s1260_s5 = inlined_call_operand.vmem [shape: f32[9,48], index: 5, kind: input, shape index: {}]   ;;  %s1261_s6 = inlined_call_operand.hbm [shape: f32[1,48], index: 6, kind: input, shape index: {}]   ;;  %s1262_s7 = inlined_call_operand.vmem [shape: f32[2,10], index: 7, kind: input, shape index: {}]   ;;  %s1263_s8 = inlined_call_operand.vmem [shape: f32[2,10], index: 8, kind: input, shape index: {}]   ;;  %s1264_s9 = inlined_call_operand.vmem [shape: f32[3,2,8], index: 9, kind: input, shape index: {}]   ;;  %s1265_s10 = inlined_call_operand.vmem [shape: f32[3,2,8], index: 10, kind: input, shape index: {}]   ;;  %s1266_s11 = inlined_call_operand.vmem [shape: f32[2,8], index: 11, kind: input, shape index: {}]   ;;  %s1267_s12 = inlined_call_operand.vmem [shape: f32[2,3], index: 12, kind: input, shape index: {}]   ;;  %s1268_s13 = inlined_call_operand.vmem [shape: f32[2,2,8], index: 13, kind: input, shape index: {}]   ;;  %s1269_s14 = inlined_call_operand.vmem [shape: f32[2,8], index: 14, kind: input, shape index: {}]   ;;  %s1270_s15 = inlined_call_operand.hbm [shape: f32[1,1,8], index: 15, kind: output, shape index: {}]  }
   0x1   :  { %21 = vsyncpa [#allocation7], 0 }
   0x2   :  { %22 = vsyncpa [#allocation10], 0 }
   0x3   :  { %23 = vsyncpa [#allocation5], 0  ;;  %s948_s18 = smov [#allocation6]   ;;  %s949_s20 = smov [#allocation3]  }
   0x4   :  { %s48_s19 = sshll.u32 %s948_s18, 4  ;;  %s34_s21 = sshll.u32 %s949_s20, 4  ;;  %s49_s19 = int_to_ptr.vmem [resolvable:$true] %s48_s19  ;;  %s35_s21 = int_to_ptr.vmem [resolvable:$true] %s34_s21 }
   0x5   :  { %s842_s24 = scalar_lea.hbm %s1256_s1, 64 }
   0x6   :  { %p843_p0 = scmp.ne.s32.totalorder %s1256_s1, %s842_s24  ;;  %p846_p1 = scmp.lt.u32.totalorder %s842_s24, %s1256_s1 }
   0x8   :  { %p848_p2 = pnand %p846_p1, %p843_p0 }
   0xa   :  { %851 = shalt.err (!%p848_p2)
}
   0xb   :  { %s852_s29 = scalar_lea.vmem %s49_s19, 64  ;;  %p857_p4 = scmp.lt.s32.totalorder %s49_s19, %s49_s19 }
   0xc   :  { %p853_p3 = scmp.ne.s32.totalorder %s49_s19, %s852_s29  ;;  %p858_p5 = scmp.lt.s32.totalorder %s852_s29, %s852_s29 }
   0xe   :  { %p859_p6 = por %p858_p5, %p857_p4 }
  0x10   :  { %p860_p7 = pnand %p859_p6, %p853_p3 }
  0x12   :  { %863 = shalt.err (!%p860_p7)
}
  0x13   :  { %51 = dma.hbm_to_vmem [thread:$0]  %s1256_s1, 64, %s49_s19, [#allocation7]  }
  0x14   :  { %s864_s20 = scalar_lea.hbm %s1255_s0, 64 }
  0x15   :  { %p865_p8 = scmp.ne.s32.totalorder %s1255_s0, %s864_s20  ;;  %p868_p9 = scmp.lt.u32.totalorder %s864_s20, %s1255_s0 }
  0x17   :  { %p870_p10 = pnand %p868_p9, %p865_p8 }
  0x19   :  { %873 = shalt.err (!%p870_p10)
}
  0x1a   :  { %s874_s26 = scalar_lea.vmem %s35_s21, 64  ;;  %p879_p12 = scmp.lt.s32.totalorder %s35_s21, %s35_s21 }
  0x1b   :  { %p875_p11 = scmp.ne.s32.totalorder %s35_s21, %s874_s26  ;;  %p880_p13 = scmp.lt.s32.totalorder %s874_s26, %s874_s26 }
  0x1d   :  { %p881_p0 = por %p880_p13, %p879_p12 }
  0x1f   :  { %p882_p1 = pnand %p881_p0, %p875_p11 }
  0x21   :  { %885 = shalt.err (!%p882_p1)
}
  0x22   :  { %37 = dma.hbm_to_vmem [thread:$0]  %s1255_s0, 64, %s35_s21, [#allocation4]  }
  0x23   :  { %s950_s27 = smov [#allocation8]   ;;  %s951_s29 = smov [#allocation9]  }
  0x24   :  { %s62_s28 = sshll.u32 %s950_s27, 4  ;;  %s74_s30 = sshll.u32 %s951_s29, 4  ;;  %s63_s28 = int_to_ptr.vmem [resolvable:$true] %s62_s28  ;;  %s75_s30 = int_to_ptr.vmem [resolvable:$true] %s74_s30 }
  0x25   :  { %s886_s18 = scalar_lea.hbm %s1259_s4, 64 }
  0x26   :  { %p887_p2 = scmp.ne.s32.totalorder %s1259_s4, %s886_s18  ;;  %p890_p3 = scmp.lt.u32.totalorder %s886_s18, %s1259_s4 }
  0x28   :  { %p892_p4 = pnand %p890_p3, %p887_p2 }
  0x2a   :  { %895 = shalt.err (!%p892_p4)
}
  0x2b   :  { %s896_s0 = scalar_lea.vmem %s63_s28, 64  ;;  %p901_p6 = scmp.lt.s32.totalorder %s63_s28, %s63_s28 }
  0x2c   :  { %p897_p5 = scmp.ne.s32.totalorder %s63_s28, %s896_s0  ;;  %p902_p7 = scmp.lt.s32.totalorder %s896_s0, %s896_s0 }
  0x2e   :  { %p903_p8 = por %p902_p7, %p901_p6 }
  0x30   :  { %p904_p9 = pnand %p903_p8, %p897_p5 }
  0x32   :  { %907 = shalt.err (!%p904_p9)
}
  0x33   :  { %65 = dma.hbm_to_vmem [thread:$0]  %s1259_s4, 64, %s63_s28, [#allocation7]  }
  0x34   :  { %s908_s19 = scalar_lea.hbm %s1261_s6, 16 }
  0x35   :  { %p909_p10 = scmp.ne.s32.totalorder %s1261_s6, %s908_s19  ;;  %p912_p11 = scmp.lt.u32.totalorder %s908_s19, %s1261_s6 }
  0x37   :  { %p914_p12 = pnand %p912_p11, %p909_p10 }
  0x39   :  { %917 = shalt.err (!%p914_p12)
}
  0x3a   :  { %s918_s18 = scalar_lea.vmem %s75_s30, 16  ;;  %s922_s20 = scalar_lea.vmem %s75_s30, 32 }
  0x3b   :  { %p919_p13 = scmp.ne.s32.totalorder %s75_s30, %s918_s18  ;;  %p923_p0 = scmp.lt.s32.totalorder %s75_s30, %s75_s30 }
  0x3c   :  { %p924_p1 = scmp.lt.s32.totalorder %s922_s20, %s918_s18 }
  0x3e   :  { %p925_p2 = por %p924_p1, %p923_p0 }
  0x40   :  { %p926_p3 = pnand %p925_p2, %p919_p13 }
  0x42   :  { %929 = shalt.err (!%p926_p3)
}
  0x43   :  { %77 = dma.hbm_to_vmem [thread:$0]  %s1261_s6, 16, %s75_s30, [#allocation10]  }
  0x44   :  { %940 = dma.done.wait [#allocation4], 64  }
  0x45   :  { %941 = vsyncadd [#allocation4], 4294967232 }
  0x46   :  { %942 = dma.done.wait [#allocation7], 128  }
  0x47   :  { %943 = vsyncadd [#allocation7], 4294967168 }
  0x48   :  { %944 = dma.done.wait [#allocation10], 16  }
  0x49   :  { %945 = vsyncadd [#allocation10], 4294967280  ;;  %v952_v0 = vmov 1   ;;  %v953_v1 = vmov 2   ;;  %v1097_v2 = vld [vmem:[%s1264_s9] sm:$0x3]  ;;  %v138_v16 = vlaneseq }
  0x4a   :  { %825 = vset.pattern.permute.xlu0 %v952_v0  ;;  %828 = vset.pattern.permute.xlu1 %v953_v1  ;;  %v1102_v3 = vld [vmem:[%s1264_s9 + $0x2] sm:$0x3]  ;;  %s954_s6 = smov 127   ;;  %v1109_v4 = vld [vmem:[%s1265_s10] sm:$0x3]  ;;  %v955_v12 = vmov 0  }
  0x4b   :  { %552 = vrot.lane.b32.xlu0 %v1097_v2, %s954_s6  ;;  %587 = vrot.lane.b32.xlu1 %v1102_v3, %s954_s6  ;;  %v1114_v5 = vld [vmem:[%s1265_s10 + $0x2] sm:$0x3]  ;;  %v666_v6 = vld [vmem:[%s1267_s12] sm:$0x3]  ;;  %v956_v14 = vmov 1983009808  }
  0x4c   :  { %v667_v7 = vmul.f32 16.0, %v666_v6  ;;  %v1124_v9 = vld [vmem:[%s1265_s10 + $0x4] sm:$0x3]  ;;  %v136_v15 = vunpack.c.l.s4 %v956_v14  ;;  %v131_v18 = vld [vmem:[#allocation6] sm:$0xf]  ;;  %v139_v21 = vshrl.u32 %v138_v16, 7 }
  0x4d   :  { %v1129_v10 = vld [vmem:[%s1264_s9 + $0x4] sm:$0x3]  ;;  %v1134_v22 = vld [vmem:[#allocation8] sm:$0x7]  ;;  %vm145_vm0 = vcmask 1041408   ;;  %vm147_vm1 = vcmask 517120  }
  0x4e   :  { %v668_v8 = vadd.f32 1e-09, %v667_v7  ;;  %v130_v17 = vld [vmem:[#allocation3] sm:$0xf]  ;;  %v137_v20 = vunpack.c.0.s8 %v136_v15  ;;  %v167_v23 = vadd.f32 1e-08, %v1134_v22 }
  0x4f   :  { %558 = vrot.lane.b32.xlu0 %v1109_v4, %s954_s6  ;;  %593 = vrot.lane.b32.xlu1 %v1114_v5, %s954_s6  ;;  %v132_v19 = vsub.f32 %v130_v17, %v131_v18  ;;  %v957_v47 = vmov 2102212464   ;;  %v958_v51 = vmov 683565275   ;;  %v959_v53 = vmov 2475754826  }
  0x50   :  { %830 = vrcp.f32 %v668_v8  ;;  %v168_v24 = vmul.f32 %v167_v23, %v167_v23  ;;  %v140_v26 = vsub.s32 %v137_v20, %v139_v21  ;;  %v960_v56 = vmov 2131351028   ;;  %s930_s18 = scalar_lea.hbm %s1270_s15, 16 }
  0x51   :  { %v133_v25 = vand.u32 2147483647, %v132_v19  ;;  %v961_v62 = vmov 920167782   ;;  %v962_v8 = vmov 1326507024   ;;  %p931_p4 = scmp.ne.s32.totalorder %s1270_s15, %s930_s18  ;;  %p934_p5 = scmp.lt.u32.totalorder %s930_s18, %s1270_s15 }
  0x52   :  { %v170_v27 = vrot.slane %v168_v24, 1  ;;  %v173_v29 = vrot.slane %v168_v24, 2 }
  0x53   :  { %629 = vrot.lane.b32.xlu1 %v1124_v9, %s954_s6  ;;  %623 = vrot.lane.b32.xlu0 %v1129_v10, %s954_s6  ;;  %v141_v30 = vrot.slane %v133_v25, %v140_v26  ;;  %p936_p6 = pnand %p934_p5, %p931_p4 }
  0x54   :  { %v172_v28 = vadd.f32 %v170_v27, %v168_v24 }
  0x55   :  { %v142_v32 = vcombine.high %v141_v30, %v141_v30  ;;  %v146_v33 = vsel %vm145_vm0, %v141_v30, 0.0 }
  0x56   :  { %v175_v31 = vadd.f32 %v173_v29, %v172_v28 }
  0x57   :  { %673 = vperm.xlu0 %825, %v666_v6   ;;  %v148_v34 = vsel %vm147_vm1, %v142_v32, 0.0 }
  0x58   :  { %832 = vrsqrt.f32 %v175_v31  ;;  %v149_v35 = vadd.f32 %v148_v34, %v146_v33 }
  0x5a   :  { %v831_v11 = vpop.eup %830 }
  0x5b   :  { %826 = vset.pattern.permute.xlu0 %v955_v12  ;;  %v670_v13 = vmul.f32 10000.0, %v831_v11 }
  0x5d   :  { %684 = vperm.xlu0 %826, %v670_v13  }
  0x61   :  { %827 = vset.pattern.permute.xlu0 %v953_v1 }
  0x62   :  { %678 = vperm.xlu0 %827, %v666_v6   ;;  %v1137_v36 = vpop.eup %832 }
  0x63   :  { %v177_v37 = vmul.f32 %v1137_v36, %v175_v31 }
  0x65   :  { %v1140_v38 = vmul.f32 0.5, %v177_v37 }
  0x67   :  { %v182_v39 = vand.u32 2139095040, %v1140_v38  ;;  %v179_v46 = vand.u32 2147483647, %v1140_v38  ;;  %vm181_vm9 = vcmp.lt.s32.totalorder %v1140_v38, 0  ;;  %vm271_vm1 = vweird.f32 %v1140_v38 }
  0x69   :  { %v183_v40 = vshrl.u32 %v182_v39, 23  ;;  %v186_v49 = vand.u32 8388607, %v179_v46  ;;  %vm180_vm10 = vcmp.le.f32.partialorder %v179_v46, 0.7853982 }
  0x6b   :  { %v773_v41 = vadd.s32 4294967169, %v183_v40  ;;  %v187_v60 = vor.u32 8388608, %v186_v49 }
  0x6d   :  { %v189_v42 = vadd.s32 1, %v773_v41  ;;  %v227_v16 = vshll.u32 %v187_v60, 8 }
  0x6f   :  { %vm190_vm2 = vcmp.gt.s32.totalorder %v189_v42, 0 }
  0x70   :  { %v191_v43 = vsel %vm190_vm2, %v189_v42, 0  ;;  %vm112_vm2 = vcmask 1024  }
  0x71   :  { %v193_v44 = vand.u32 31, %v191_v43  ;;  %v192_v50 = vshrl.u32 %v191_v43, 5 }
  0x73   :  { %v194_v45 = vsub.s32 32, %v193_v44  ;;  %v205_v48 = vshll.u32 %v957_v47, %v193_v44  ;;  %v196_v52 = vshll.u32 %v958_v51, %v193_v44  ;;  %v199_v55 = vshll.u32 %v959_v53, %v193_v44 }
  0x74   :  { %v202_v58 = vshll.u32 %v960_v56, %v193_v44  ;;  %v208_v0 = vshll.u32 %v961_v62, %v193_v44  ;;  %vm211_vm3 = vcmp.lt.s32.totalorder %v192_v50, 1  ;;  %vm213_vm4 = vcmp.lt.s32.totalorder %v192_v50, 3 }
  0x75   :  { %v197_v54 = vshrl.u32 %v959_v53, %v194_v45  ;;  %v200_v57 = vshrl.u32 %v960_v56, %v194_v45  ;;  %v203_v59 = vshrl.u32 %v957_v47, %v194_v45  ;;  %v206_v63 = vshrl.u32 %v961_v62, %v194_v45 }
  0x76   :  { %v209_v11 = vshrl.u32 %v962_v8, %v194_v45  ;;  %vm212_vm5 = vcmp.lt.s32.totalorder %v192_v50, 2  ;;  %vm214_vm6 = vcmp.lt.s32.totalorder %v192_v50, 4  ;;  %v195_v17 = vshrl.u32 %v958_v51, %v194_v45 }
  0x77   :  { %150 = vadd.xlane.f32.xlu1 %v149_v35  ;;  %v198_v61 = vor.u32 %v197_v54, %v196_v52  ;;  %v201_v1 = vor.u32 %v200_v57, %v199_v55  ;;  %v204_v6 = vor.u32 %v203_v59, %v202_v58  ;;  %v207_v7 = vor.u32 %v206_v63, %v205_v48 }
  0x78   :  { %v210_v14 = vor.u32 %v209_v11, %v208_v0 }
  0x79   :  { %v219_v13 = vsel %vm211_vm3, %v198_v61, %v201_v1  ;;  %v220_v15 = vsel %vm214_vm6, %v207_v7, 920167782  ;;  %v223_v19 = vsel %vm211_vm3, %v201_v1, %v204_v6  ;;  %v216_v20 = vsel %vm214_vm6, %v204_v6, 2102212464 }
  0x7a   :  { %v221_v18 = vsel %vm213_vm4, %v204_v6, %v220_v15  ;;  %v224_v23 = vsel %vm214_vm6, %v210_v14, 1326507024  ;;  %v215_v24 = vsel %vm211_vm3, %v195_v17, %v198_v61  ;;  %v217_v25 = vsel %vm213_vm4, %v201_v1, %v216_v20 }
  0x7b   :  { %v222_v21 = vsel %vm212_vm5, %v219_v13, %v221_v18  ;;  %v225_v26 = vsel %vm213_vm4, %v207_v7, %v224_v23  ;;  %v218_v27 = vsel %vm212_vm5, %v215_v24, %v217_v25  ;;  %vm533_vm3 = vcmask 74752  }
  0x7c   :  { %v226_v28 = vsel %vm212_vm5, %v223_v19, %v225_v26  ;;  %v1152_v29 = vmul.u32.u64.low %v227_v16, %v222_v21  ;;  %v1153_v30 = vmul.u32.u64.high %v227_v16, %v222_v21, %v1152_v29  ;;  %v234_v33 = vmul.u32 %v227_v16, %v218_v27 }
  0x7d   :  { %v1155_v31 = vmul.u32.u64.low %v227_v16, %v226_v28  ;;  %v1156_v32 = vmul.u32.u64.high %v227_v16, %v226_v28, %v1155_v31  ;;  %v389_v28 = vrot.slane %v1137_v36, 7  ;;  %vm517_vm4 = vcmask 385024  }
  0x7e   :  { %v237_v34 = vadd.s32 1, %v1153_v30 }
  0x7f   :  { %vm236_vm7 = vc.u32 %v1156_v32, %v1152_v29  ;;  %v235_v48 = vadd.s32 %v1152_v29, %v1156_v32 }
  0x80   :  { %v238_v35 = vsel %vm236_vm7, %v237_v34, %v1153_v30 }
  0x81   :  { %v239_v37 = vadd.s32 %v238_v35, %v234_v33  ;;  %v391_v35 = vmul.f32 %v389_v28, %v1134_v22 }
  0x83   :  { %v240_v39 = vadd.s32 536870912, %v239_v37 }
  0x85   :  { %v241_v40 = vshrl.u32 %v240_v39, 30 }
  0x87   :  { %v242_v41 = vshll.u32 %v241_v40, 30  ;;  %v265_v7 = vsub.s32 4, %v241_v40 }
  0x89   :  { %v243_v42 = vsub.s32 %v239_v37, %v242_v41  ;;  %v266_v11 = vsel %vm181_vm9, %v265_v7, %v241_v40  ;;  %v396_v37 = vrot.slane %v1137_v36, 6  ;;  %v386_v41 = vmul.f32 %v1137_v36, %v1134_v22 }
  0x8a   :  { %v268_v15 = vsel %vm180_vm10, 0, %v266_v11 }
  0x8b   :  { %v245_v43 = vsub.s32 0, %v243_v42  ;;  %v375_v17 = vadd.s32 3, %v268_v15  ;;  %v272_v26 = vand.u32 3, %v268_v15 }
  0x8d   :  { %v774_v44 = vmin.u32 %v245_v43, %v243_v42  ;;  %v376_v20 = vand.u32 3, %v375_v17  ;;  %vm274_vm13 = vcmp.eq.s32.totalorder %v272_v26, 0  ;;  %vm277_vm14 = vcmp.eq.s32.totalorder %v272_v26, 2 }
  0x8e   :  { %vm273_vm0 = vcmp.lt.s32.totalorder %v272_v26, 2 }
  0x8f   :  { %v247_v45 = vclz %v774_v44  ;;  %vm378_vm11 = vcmp.eq.s32.totalorder %v376_v20, 0  ;;  %vm381_vm12 = vcmp.eq.s32.totalorder %v376_v20, 2  ;;  %vm377_vm15 = vcmp.lt.s32.totalorder %v376_v20, 2 }
  0x90   :  { %v393_v44 = vrot.slane %v391_v35, 1 }
  0x91   :  { %v775_v47 = vadd.s32 4294967294, %v247_v45  ;;  %v398_v45 = vmul.f32 %v396_v37, %v1134_v22  ;;  %v445_v37 = vld [vmem:[%s1260_s5] sm:$0xff] }
  0x93   :  { %vm776_vm8 = vcmp.lt.s32.totalorder %v775_v47, 0 }
  0x94   :  { %v250_v49 = vsel %vm776_vm8, 0, %v775_v47 }
  0x95   :  { %v251_v50 = vsub.s32 32, %v250_v49  ;;  %v252_v51 = vshll.u32 %v243_v42, %v250_v49  ;;  %v255_v52 = vsub.s32 4294967266, %v250_v49 }
  0x97   :  { %v253_v53 = vshrl.u32 %v235_v48, %v251_v50  ;;  %v256_v54 = vadd.s32 127, %v255_v52  ;;  %v400_v52 = vrot.slane %v398_v45, 2 }
  0x99   :  { %v254_v55 = vor.u32 %v253_v53, %v252_v51  ;;  %v257_v56 = vshll.u32 %v256_v54, 23 }
  0x9b   :  { %v258_v57 = vor.u32 4788187, %v257_v56  ;;  %v261_v58 = vcvt.s32.f32 %v254_v55 }
  0x9d   :  { %v259_v59 = vand.u32 2147483647, %v258_v57 }
  0x9f   :  { %v262_v60 = vmul.f32 %v261_v58, %v259_v59  ;;  %v963_v59 = vmov 0.0  }
  0xa0   :  { %113 = vst.msk [vmem:[#allocation2] sm:$0x3] %vm112_vm2, %v963_v59 }
  0xa1   :  { %v263_v61 = vxor.u32 2147483648, %v262_v60 }
  0xa3   :  { %v264_v62 = vsel %vm181_vm9, %v263_v61, %v262_v60  ;;  %v528_v61 = vld [vmem:[%s1262_s7] sm:$0x3] }
  0xa4   :  { %v267_v1 = vsel %vm180_vm10, %v1140_v38, %v264_v62  ;;  %v529_v62 = vld [vmem:[%s1263_s8] sm:$0x3]  ;;  %vm655_vm10 = vcmask 58368  }
  0xa5   :  { %834 = vcosq.f32 %v267_v1 }
  0xa6   :  { %836 = vsinq.f32 %v267_v1 }
  0xaf   :  { %v835_v29 = vpop.eup %834 }
  0xb0   :  { %v837_v32 = vpop.eup %836  ;;  %v278_v33 = vxor.u32 2147483648, %v835_v29 }
  0xb1   :  { %v275_v34 = vxor.u32 2147483648, %v837_v32 }
  0xb2   :  { %v279_v39 = vsel %vm277_vm14, %v278_v33, %v837_v32  ;;  %v383_v40 = vsel %vm381_vm12, %v278_v33, %v837_v32 }
  0xb3   :  { %v276_v42 = vsel %vm274_vm13, %v835_v29, %v275_v34  ;;  %v380_v43 = vsel %vm378_vm11, %v835_v29, %v275_v34 }
  0xb4   :  { %v280_v47 = vsel %vm273_vm0, %v276_v42, %v279_v39  ;;  %v384_v48 = vsel %vm377_vm15, %v380_v43, %v383_v40 }
  0xb5   :  { %v281_v50 = vsel %vm271_vm1, nan, %v280_v47  ;;  %v385_v51 = vsel %vm271_vm1, nan, %v384_v48 }
  0xb6   :  { %v387_v38 = vmul.f32 %v386_v41, %v385_v51  ;;  %v395_v53 = vmul.f32 %v393_v44, %v385_v51  ;;  %v403_v54 = vmul.f32 %v281_v50, %v281_v50  ;;  %v402_v55 = vmul.f32 %v400_v52, %v385_v51 }
  0xb8   :  { %v404_v56 = vmul.f32 %v387_v38, %v387_v38  ;;  %v406_v36 = vmul.f32 %v395_v53, %v395_v53  ;;  %v408_v58 = vmul.f32 %v402_v55, %v402_v55 }
  0xba   :  { %v405_v57 = vadd.f32 %v404_v56, %v403_v54 }
  0xbc   :  { %v407_v22 = vadd.f32 %v406_v36, %v405_v57 }
  0xbd   :  { %v553_v63 = vpop.permute.xlu0 %552  ;;  %v588_v0 = vpop.permute.xlu1 %587 }
  0xbe   :  { %v555_v6 = vadd.f32 %v553_v63, %v1097_v2  ;;  %v590_v46 = vadd.f32 %v1102_v3, %v588_v0  ;;  %v409_v60 = vadd.f32 %v408_v58, %v407_v22  ;;  %v530_v0 = vsub.f32 %v528_v61, %v529_v62 }
  0xc0   :  { %v556_v8 = vmul.f32 0.5, %v555_v6  ;;  %v591_v24 = vmul.f32 0.5, %v590_v46  ;;  %838 = vrsqrt.f32 %v409_v60  ;;  %v532_v15 = vmul.f32 %v530_v0, %v530_v0 }
  0xc1   :  { %v559_v13 = vpop.permute.xlu0 %558  ;;  %v594_v14 = vpop.permute.xlu1 %593 }
  0xc2   :  { %v561_v16 = vadd.f32 %v559_v13, %v1109_v4  ;;  %565 = vperm.xlu0 %827, %v556_v8   ;;  %v596_v18 = vadd.f32 %v1114_v5, %v594_v14  ;;  %v534_v39 = vsel %vm533_vm3, %v532_v15, 0.0  ;;  %v446_v15 = vld [vmem:[%s1260_s5 + $0x8] sm:$0x1] }
  0xc4   :  { %v562_v19 = vmul.f32 0.5, %v561_v16  ;;  %v597_v27 = vmul.f32 0.5, %v596_v18 }
  0xc5   :  { %v630_v21 = vpop.permute.xlu1 %629  ;;  %v624_v23 = vpop.permute.xlu0 %623 }
  0xc6   :  { %571 = vperm.xlu0 %827, %v562_v19   ;;  %v626_v25 = vadd.f32 %v1129_v10, %v624_v23  ;;  %v632_v30 = vadd.f32 %v1124_v9, %v630_v21 }
  0xc8   :  { %v627_v31 = vmul.f32 0.5, %v626_v25  ;;  %v633_v49 = vmul.f32 0.5, %v632_v30 }
  0xca   :  { %600 = vperm.xlu0 %827, %v591_v24   ;;  %636 = vperm.xlu1 %828, %v627_v31   ;;  %v839_v63 = vpop.eup %838 }
  0xcb   :  { %v411_v1 = vmul.f32 %v839_v63, %v281_v50  ;;  %v412_v6 = vmul.f32 %v839_v63, %v387_v38  ;;  %v413_v7 = vmul.f32 %v839_v63, %v395_v53  ;;  %v414_v8 = vmul.f32 %v839_v63, %v402_v55 }
  0xcd   :  { %v415_v11 = vmul.f32 %v411_v1, %v411_v1  ;;  %v416_v13 = vmul.f32 %v412_v6, %v412_v6  ;;  %v417_v14 = vmul.f32 %v413_v7, %v413_v7  ;;  %v421_v16 = vmul.f32 %v414_v8, %v411_v1 }
  0xce   :  { %606 = vperm.xlu0 %827, %v597_v27   ;;  %v422_v46 = vmul.f32 %v413_v7, %v412_v6  ;;  %v423_v17 = vmul.f32 %v414_v8, %v412_v6  ;;  %v418_v18 = vmul.f32 %v414_v8, %v414_v8  ;;  %v419_v23 = vmul.f32 %v412_v6, %v411_v1 }
  0xcf   :  { %v425_v19 = vadd.f32 %v416_v13, %v415_v11  ;;  %v435_v21 = vsub.f32 %v415_v11, %v416_v13  ;;  %v424_v24 = vmul.f32 %v414_v8, %v413_v7  ;;  %v429_v26 = vmul.f32 2.0, %v421_v16 }
  0xd0   :  { %v428_v25 = vmul.f32 2.0, %v422_v46  ;;  %v432_v28 = vmul.f32 2.0, %v423_v17  ;;  %v439_v40 = vmul.f32 2.0, %v419_v23 }
  0xd1   :  { %v426_v27 = vsub.f32 %v425_v19, %v417_v14  ;;  %v436_v29 = vadd.f32 %v435_v21, %v417_v14  ;;  %v438_v35 = vmul.f32 2.0, %v424_v24  ;;  %v443_v63 = vsub.f32 %v435_v21, %v417_v14 }
  0xd2   :  { %642 = vperm.xlu0 %827, %v633_v49   ;;  %v430_v30 = vsub.f32 %v428_v25, %v429_v26  ;;  %v434_v31 = vadd.f32 %v429_v26, %v428_v25 }
  0xd3   :  { %v427_v32 = vsub.f32 %v426_v27, %v418_v18  ;;  %v437_v34 = vsub.f32 %v436_v29, %v418_v18  ;;  %v440_v47 = vsub.f32 %v438_v35, %v439_v40  ;;  %v442_v38 = vadd.f32 %v439_v40, %v438_v35  ;;  %v515_v27 = vld [vmem:[#allocation9] sm:$0x1] }
  0xd4   :  { %v450_v41 = vrot.slane %v430_v30, 7  ;;  %v468_v44 = vrot.slane %v434_v31, 5  ;;  %v444_v8 = vadd.f32 %v443_v63, %v418_v18  ;;  %v155_v18 = vld [vmem:[%s1257_s2] sm:$0x3] }
  0xd5   :  { %v447_v42 = vsub.f32 %v445_v37, %v427_v32  ;;  %v477_v45 = vrot.slane %v437_v34, 4  ;;  %v486_v36 = vrot.slane %v440_v47, 3  ;;  %v504_v22 = vrot.slane %v442_v38, 1  ;;  %v157_v30 = vld [vmem:[#allocation2] sm:$0x3] }
  0xd6   :  { %829 = vset.pattern.permute.xlu0 %v955_v12  ;;  %v420_v12 = vmul.f32 %v413_v7, %v411_v1  ;;  %v452_v49 = vsub.f32 %v445_v37, %v450_v41  ;;  %v470_v51 = vsub.f32 %v445_v37, %v468_v44  ;;  %v512_v23 = vsub.f32 %v446_v15, %v444_v8  ;;  %v674_v35 = vpop.permute.xlu0 %673 }
  0xd7   :  { %v479_v52 = vsub.f32 %v445_v37, %v477_v45  ;;  %v448_v53 = vmul.f32 %v447_v42, %v447_v42  ;;  %v488_v62 = vsub.f32 %v445_v37, %v486_v36  ;;  %v506_v6 = vsub.f32 %v445_v37, %v504_v22 }
  0xd8   :  { %v431_v20 = vmul.f32 2.0, %v420_v12  ;;  %v453_v54 = vmul.f32 %v452_v49, %v452_v49  ;;  %v471_v56 = vmul.f32 %v470_v51, %v470_v51  ;;  %v513_v25 = vmul.f32 %v512_v23, %v512_v23  ;;  %v694_v49 = vld [vmem:[%s1268_s13] sm:$0x3] }
  0xd9   :  { %v480_v58 = vmul.f32 %v479_v52, %v479_v52  ;;  %v489_v7 = vmul.f32 %v488_v62, %v488_v62  ;;  %v507_v17 = vmul.f32 %v506_v6, %v506_v6  ;;  %v676_v47 = vadd.f32 %v674_v35, %v1097_v2 }
  0xda   :  { %v433_v33 = vadd.f32 %v432_v28, %v431_v20  ;;  %v441_v48 = vsub.f32 %v432_v28, %v431_v20  ;;  %v455_v57 = vrot.slane %v453_v54, 1  ;;  %v473_v61 = vrot.slane %v471_v56, 3 }
  0xdb   :  { %v482_v13 = vrot.slane %v480_v58, 4  ;;  %v491_v46 = vrot.slane %v489_v7, 5  ;;  %v509_v14 = vrot.slane %v507_v17, 7 }
  0xdc   :  { %v459_v43 = vrot.slane %v433_v33, 6  ;;  %v495_v59 = vrot.slane %v441_v48, 2  ;;  %v457_v0 = vadd.f32 %v455_v57, %v448_v53  ;;  %v789_v48 = vld [vmem:[%s1268_s13 + $0x2] sm:$0x3]  ;;  %v695_v53 = vmul.f32 0.13333334, %v694_v49 }
  0xde   :  { %v461_v50 = vsub.f32 %v445_v37, %v459_v43  ;;  %v497_v1 = vsub.f32 %v445_v37, %v495_v59  ;;  %v685_v37 = vpop.permute.xlu0 %684  ;;  %v788_v36 = vadd.f32 -1.0, %v695_v53 }
  0xdf   :  { %v687_v40 = vadd.f32 %v1129_v10, %v685_v37 }
  0xe0   :  { %v462_v55 = vmul.f32 %v461_v50, %v461_v50  ;;  %v498_v12 = vmul.f32 %v497_v1, %v497_v1  ;;  %v699_v50 = vmul.f32 0.13333334, %v789_v48 }
  0xe1   :  { %840 = vrcp.f32 %v687_v40 }
  0xe2   :  { %v464_v60 = vrot.slane %v462_v55, 2  ;;  %v500_v20 = vrot.slane %v498_v12, 6  ;;  %v790_v54 = vadd.f32 -1.0, %v699_v50 }
  0xe4   :  { %v466_v11 = vadd.f32 %v464_v60, %v457_v0 }
  0xe6   :  { %v475_v16 = vadd.f32 %v473_v61, %v466_v11 }
  0xe8   :  { %v484_v19 = vadd.f32 %v482_v13, %v475_v16 }
  0xea   :  { %v493_v24 = vadd.f32 %v491_v46, %v484_v19 }
  0xeb   :  { %v841_v45 = vpop.eup %840 }
  0xec   :  { %v502_v21 = vadd.f32 %v500_v20, %v493_v24  ;;  %v690_v52 = vmul.f32 %v841_v45, %v676_v47 }
  0xee   :  { %v511_v26 = vadd.f32 %v509_v14, %v502_v21  ;;  %v691_v56 = vmul.f32 666.6667, %v690_v52 }
  0xf0   :  { %v514_v28 = vadd.f32 %v513_v25, %v511_v26  ;;  %v702_v60 = vsub.f32 %v691_v56, %v788_v36 }
  0xf1   :  { %535 = vadd.xlane.f32.xlu0 %v534_v39  ;;  %v679_v39 = vpop.permute.xlu0 %678 }
  0xf2   :  { %v516_v32 = vmul.f32 %v515_v27, %v514_v28  ;;  %v681_v44 = vadd.f32 %v1102_v3, %v679_v39  ;;  %v703_v11 = vand.u32 2147483647, %v702_v60  ;;  %v705_v13 = vmul.f32 0.5, %v702_v60 }
  0xf4   :  { %v518_v34 = vsel %vm517_vm4, %v516_v32, 0.0  ;;  %v692_v51 = vmul.f32 %v841_v45, %v681_v44  ;;  %vm1218_vm6 = vcmp.lt.f32.partialorder %v703_v11, 1.0  ;;  %v548_v44 = vld [vmem:[%s1266_s11] sm:$0x3] }
  0xf5   :  { %519 = vadd.xlane.f32.xlu1 %v518_v34  ;;  %v701_v34 = vld [vmem:[%s1269_s14] sm:$0x3]  ;;  %s964_s14 = smov 0.0  }
  0xf6   :  { %v693_v55 = vmul.f32 666.6667, %v692_v51  ;;  %125 = sst [smem:[#allocation11 + $0x5]] %s964_s14 }
  0xf7   :  { %127 = sst [smem:[#allocation11 + $0x6]] %s964_s14 }
  0xf8   :  { %v709_v59 = vsub.f32 %v693_v55, %v790_v54  ;;  %129 = sst [smem:[#allocation11 + $0x7]] %s964_s14 }
  0xfa   :  { %v710_v1 = vand.u32 2147483647, %v709_v59  ;;  %v712_v6 = vmul.f32 0.5, %v709_v59 }
  0xfc   :  { %v713_v16 = vmul.f32 %v712_v6, %v709_v59  ;;  %vm1214_vm5 = vcmp.lt.f32.partialorder %v710_v1, 1.0  ;;  %v792_v17 = vadd.f32 -0.5, %v710_v1 }
  0xfe   :  { %v715_v26 = vsel %vm1214_vm5, %v713_v16, %v792_v17 }
 0x104   :  { %v151_v29 = vpop.xlane.xlu1 %150 }
 0x105   :  { %v156_v31 = vmul.f32 %v155_v18, %v151_v29 }
 0x107   :  { %v158_v33 = vadd.f32 %v157_v30, %v156_v31  ;;  %v531_v30 = vld [vmem:[%s1258_s3] sm:$0x3] }
 0x109   :  { %160 = vst.msk [vmem:[#allocation2] sm:$0x3] %vm112_vm2, %v158_v33 }
 0x110   :  { %v743_v49 = vld [vmem:[#allocation2] sm:$0x3] }
 0x111   :  { %v744_v50 = vsel %vm112_vm2, %v743_v49, 0.0 }
 0x141   :  { %v566_v41 = vpop.permute.xlu0 %565 }
 0x142   :  { %v568_v7 = vsub.f32 %v1097_v2, %v566_v41 }
 0x145   :  { %v572_v42 = vpop.permute.xlu0 %571 }
 0x146   :  { %v574_v61 = vsub.f32 %v1109_v4, %v572_v42 }
 0x148   :  { %v575_v12 = vsub.f32 %v568_v7, %v574_v61 }
 0x149   :  { %v601_v43 = vpop.permute.xlu0 %600  ;;  %v637_v58 = vpop.permute.xlu1 %636 }
 0x14a   :  { %v603_v62 = vsub.f32 %v1102_v3, %v601_v43  ;;  %v639_v0 = vsub.f32 %v1129_v10, %v637_v58  ;;  %v791_v10 = vadd.f32 -0.5, %v703_v11  ;;  %v576_v2 = vand.u32 2147483647, %v575_v12 }
 0x14b   :  { %v578_v19 = vmul.f32 0.5, %v575_v12 }
 0x14c   :  { %v781_v27 = vadd.f32 -0.5, %v576_v2  ;;  %vm577_vm8 = vcmp.lt.f32.partialorder %v576_v2, 1.0 }
 0x14d   :  { %v607_v38 = vpop.permute.xlu0 %606  ;;  %v579_v18 = vmul.f32 %v578_v19, %v575_v12 }
 0x14e   :  { %v609_v22 = vsub.f32 %v1114_v5, %v607_v38 }
 0x14f   :  { %v581_v35 = vsel %vm577_vm8, %v579_v18, %v781_v27 }
 0x150   :  { %v610_v8 = vsub.f32 %v603_v62, %v609_v22 }
 0x151   :  { %v643_v57 = vpop.permute.xlu0 %642 }
 0x152   :  { %v645_v63 = vsub.f32 %v1124_v9, %v643_v57  ;;  %v611_v5 = vand.u32 2147483647, %v610_v8  ;;  %v613_v46 = vmul.f32 0.5, %v610_v8  ;;  %v706_v9 = vmul.f32 %v705_v13, %v702_v60 }
 0x154   :  { %v646_v15 = vsub.f32 %v639_v0, %v645_v63  ;;  %v614_v24 = vmul.f32 %v613_v46, %v610_v8  ;;  %v784_v14 = vadd.f32 -0.5, %v611_v5  ;;  %vm1222_vm7 = vcmp.lt.f32.partialorder %v611_v5, 1.0 }
 0x155   :  { %v708_v25 = vsel %vm1218_vm6, %v706_v9, %v791_v10 }
 0x156   :  { %v647_v20 = vand.u32 2147483647, %v646_v15  ;;  %v649_v23 = vmul.f32 0.5, %v646_v15  ;;  %v616_v31 = vsel %vm1222_vm7, %v614_v24, %v784_v14  ;;  %v716_v32 = vadd.f32 %v715_v26, %v708_v25 }
 0x157   :  { %v617_v40 = vadd.f32 %v616_v31, %v581_v35 }
 0x158   :  { %v650_v28 = vmul.f32 %v649_v23, %v646_v15  ;;  %v787_v29 = vadd.f32 -0.5, %v647_v20  ;;  %vm648_vm9 = vcmp.lt.f32.partialorder %v647_v20, 1.0  ;;  %v717_v42 = vmul.f32 %v716_v32, %v701_v34 }
 0x15a   :  { %v652_v37 = vsel %vm648_vm9, %v650_v28, %v787_v29  ;;  %v718_v45 = vsel %vm655_vm10, %v717_v42, 0.0 }
 0x15b   :  { %v653_v43 = vadd.f32 %v652_v37, %v617_v40 }
 0x15d   :  { %v654_v47 = vmul.f32 %v653_v43, %v548_v44 }
 0x15f   :  { %v656_v48 = vsel %vm655_vm10, %v654_v47, 0.0 }
 0x17e   :  { %v536_v33 = vpop.xlane.xlu0 %535 }
 0x17f   :  { %v537_v39 = vmul.f32 %v536_v33, %v531_v30 }
 0x181   :  { %v538_v41 = vsel %vm112_vm2, %v537_v39, 0.0 }
 0x182   :  { %539 = vadd.xlane.f32.xlu0 %v538_v41  ;;  %v520_v51 = vpop.xlane.xlu1 %519 }
 0x183   :  { %v521_v52 = vrot.slane %v520_v51, 4 }
 0x185   :  { %v522_v38 = vadd.f32 %v521_v52, %v520_v51 }
 0x186   :  { %719 = vadd.xlane.f32.xlu0 %v718_v45 }
 0x187   :  { %v523_v53 = vrot.slane %v522_v38, 2 }
 0x189   :  { %v524_v54 = vadd.f32 %v523_v53, %v522_v38 }
 0x18a   :  { %657 = vadd.xlane.f32.xlu0 %v656_v48 }
 0x18b   :  { %v525_v55 = vrot.slane %v524_v54, 1 }
 0x18d   :  { %v526_v56 = vadd.f32 %v525_v55, %v524_v54 }
 0x18e   :  { %745 = vadd.xlane.f32.xlu0 %v744_v50 }
 0x18f   :  { %797 = vpush %v526_v56 }
 0x1c0   :  { %s798_s11 = spop %797 }
 0x1c1   :  { %s728_s25 = smul.f32 0.0023148148, %s798_s11 }
 0x1c3   :  { %730 = sst [smem:[#allocation11 + $0x1]] %s728_s25 }
 0x20f   :  { %v540_v36 = vpop.xlane.xlu0 %539 }
 0x210   :  { %v541_v57 = vrot.slane %v540_v36, 4 }
 0x212   :  { %v542_v58 = vadd.f32 %v541_v57, %v540_v36 }
 0x213   :  { %v720_v59 = vpop.xlane.xlu0 %719 }
 0x214   :  { %v543_v22 = vrot.slane %v542_v58, 2  ;;  %v721_v60 = vrot.slane %v720_v59, 4 }
 0x216   :  { %v722_v61 = vadd.f32 %v721_v60, %v720_v59  ;;  %v544_v62 = vadd.f32 %v543_v22, %v542_v58 }
 0x217   :  { %v658_v63 = vpop.xlane.xlu0 %657 }
 0x218   :  { %v723_v0 = vrot.slane %v722_v61, 2  ;;  %v659_v1 = vrot.slane %v658_v63, 4  ;;  %v545_v6 = vrot.slane %v544_v62, 1 }
 0x21a   :  { %v660_v7 = vadd.f32 %v659_v1, %v658_v63  ;;  %v546_v8 = vadd.f32 %v545_v6, %v544_v62  ;;  %v724_v13 = vadd.f32 %v723_v0, %v722_v61 }
 0x21b   :  { %v746_v11 = vpop.xlane.xlu0 %745 }
 0x21c   :  { %v661_v12 = vrot.slane %v660_v7, 2  ;;  %v747_v15 = vrot.slane %v746_v11, 4  ;;  %799 = vpush %v546_v8  ;;  %v725_v46 = vrot.slane %v724_v13, 1 }
 0x21e   :  { %v748_v16 = vadd.f32 %v747_v15, %v746_v11  ;;  %v662_v5 = vadd.f32 %v661_v12, %v660_v7  ;;  %v726_v17 = vadd.f32 %v725_v46, %v724_v13 }
 0x220   :  { %v749_v4 = vrot.slane %v748_v16, 2  ;;  %v663_v3 = vrot.slane %v662_v5, 1 }
 0x222   :  { %v750_v9 = vadd.f32 %v749_v4, %v748_v16  ;;  %v664_v10 = vadd.f32 %v663_v3, %v662_v5 }
 0x224   :  { %801 = vpush %v664_v10  ;;  %v751_v2 = vrot.slane %v750_v9, 1 }
 0x225   :  { %803 = vpush %v726_v17 }
 0x226   :  { %v752_v19 = vadd.f32 %v751_v2, %v750_v9 }
 0x228   :  { %805 = vpush %v752_v19 }
 0x24d   :  { %s800_s26 = spop %799 }
 0x24e   :  { %s731_s1 = smul.f32 0.005, %s800_s26 }
 0x250   :  { %733 = sst [smem:[#allocation11 + $0x2]] %s731_s1 }
 0x255   :  { %s802_s19 = spop %801 }
 0x256   :  { %s734_s27 = smul.f32 0.020833334, %s802_s19  ;;  %s804_s29 = spop %803 }
 0x257   :  { %s737_s16 = smul.f32 0.03125, %s804_s29 }
 0x258   :  { %736 = sst [smem:[#allocation11 + $0x3]] %s734_s27 }
 0x259   :  { %739 = sst [smem:[#allocation11 + $0x4]] %s737_s16  ;;  %s806_s17 = spop %805 }
 0x25a   :  { %s754_s9 = smul.f32 0.0026041667, %s806_s17 }
 0x25c   :  { %756 = sst [smem:[#allocation11]] %s754_s9 }
 0x25d   :  { %939 = shalt.err (!%p936_p6)
}
 0x25e   :  { %s965_s28 = smov [#allocation11]  }
 0x25f   :  { %764 = dma.smem_to_hbm %s965_s28, 16, %s1270_s15, [#allocation5]  }
 0x260   :  { %946 = dma.done.wait [#allocation5], 16  }
 0x261   :  { %947 = vsyncadd [#allocation5], 4294967280 }
 0x262   :  { %768 = sfence }
 0x263   :  { %769 = vsyncpa [#allocation4], 1 }
 0x264   :  { %770 = vsyncpa [#allocation7], 1 }
 0x265   :  { %771 = vsyncpa [#allocation10], 1 }
 0x266   :  { %772 = vsyncpa [#allocation5], 1 }

</bundles_post_ra>
